<compile_context>
chip_gen: v7x
topology: tpu7x:2x2x1
jax: 0.10.0
libtpu: 0.0.40
codegen_flags: <defaults>
</compile_context>

<pallas_src>
import functools

import jax
import jax.numpy as jnp
from jax.experimental import pallas as pl
from jax.experimental.pallas import tpu as pltpu


_VMEM_LIMIT = 32 * 1024 * 1024   # conservative: fits v5e/v6e (128 MiB) and v7x (64 MiB)
_NEG_INF = -1e30                 # large finite negative (avoids -inf NaN pitfalls)


def _round_up(x, m):
    return (x + m - 1) // m * m


def _layernorm(x, gamma, beta, eps=1e-5):
    mean = jnp.mean(x, axis=-1, keepdims=True)
    var = jnp.mean((x - mean) ** 2, axis=-1, keepdims=True)
    return (x - mean) * jax.lax.rsqrt(var + eps) * gamma + beta


# ----------------------------- kernels ------------------------------------


def transformer_block_kernel(
    x_ref,
    ln1_g_ref, ln1_b_ref,
    wqkv_ref, wp_ref, bp_ref,
    ln2_g_ref, ln2_b_ref,
    w1_ref, b1_ref, w2_ref, b2_ref,
    o_ref,
    *, num_heads,
):
    """One TransformerBlock for one batch element (grid axis = batch).

    Reference semantics: x = ln1(x); x = x + sa(x); x = ln2(x); x = x + ff(x).
    """
    x = x_ref[0].astype(jnp.float32)          # (T, E)  2-D: dense sublane packing
    T, E = x.shape
    head_size = E // num_heads
    scale = E ** (-0.5)                       # reference scales by n_embedding^-0.5

    # ---- ln1 ----
    h = _layernorm(x, ln1_g_ref[...], ln1_b_ref[...])
    hb = h.astype(wqkv_ref.dtype)

    # ---- fused QKV projection: one (T,E)@(E,3E) bf16 matmul, f32 accumulate ----
    qkv = jnp.dot(hb, wqkv_ref[...], preferred_element_type=jnp.float32)  # (T, 3E)

    # additive causal bias (0 / -1e30), hoisted out of the per-head math
    row = jax.lax.broadcasted_iota(jnp.int32, (T, T), 0)
    col = jax.lax.broadcasted_iota(jnp.int32, (T, T), 1)
    causal_bias = jnp.where(row >= col, 0.0, _NEG_INF).astype(jnp.float32)

    # ---- multi-head attention; heads statically unrolled (head_size is tiny,
    # so a batched dot_general would not improve MXU occupancy here) ----
    heads = []
    for hd in range(num_heads):
        lo = hd * head_size
        qh = qkv[:, lo:lo + head_size]
        kh = qkv[:, E + lo:E + lo + head_size]
        vh = qkv[:, 2 * E + lo:2 * E + lo + head_size]
        scores = jax.lax.dot_general(
            qh, kh, (((1,), (1,)), ((), ())),
            preferred_element_type=jnp.float32) * scale + causal_bias
        m = jnp.max(scores, axis=-1, keepdims=True)
        p = jnp.exp(scores - m)
        denom = jnp.sum(p, axis=-1, keepdims=True)
        probs = p * pl.reciprocal(denom, approx=True)   # divide on the EUP slot
        # TODO(synk): attention dropout omitted (eval-mode identity).
        heads.append(jnp.dot(probs, vh, preferred_element_type=jnp.float32))

    # concat heads along lanes, then a single (T,E)@(E,E) output projection
    att = jnp.concatenate(heads, axis=-1).astype(wp_ref.dtype)
    att = jnp.dot(att, wp_ref[...], preferred_element_type=jnp.float32) + bp_ref[...]

    x2 = h + att                              # residual adds ln1(x) (matches ref)

    # ---- ln2 + feed-forward + residual ----
    h2 = _layernorm(x2, ln2_g_ref[...], ln2_b_ref[...])
    ff = jnp.dot(h2.astype(w1_ref.dtype), w1_ref[...],
                 preferred_element_type=jnp.float32) + b1_ref[...]
    ff = jnp.maximum(ff, 0.0)
    ff = jnp.dot(ff.astype(w2_ref.dtype), w2_ref[...],
                 preferred_element_type=jnp.float32) + b2_ref[...]
    # TODO(synk): FFN dropout omitted (eval-mode identity).
    o_ref[0] = (h2 + ff).astype(o_ref.dtype)


def lm_head_loss_kernel(x_ref, tgt_ref, ln_g_ref, ln_b_ref, w_ref, b_ref,
                        logits_ref, loss_ref, acc_ref, *, vocab_size, n_tokens):
    """Fused final LayerNorm + lm_head + mean cross-entropy.

    Grid iterates over token-row tiles.  Logits are produced lane-dense with the
    vocab padded to a multiple of 128; padded columns are masked out of the
    loss.  The scalar loss accumulates in a persistent (1,1) scratch and the
    (running, correctly-normalized-at-the-end) mean is written through every
    step so the final write-back is always correct.
    """
    i = pl.program_id(0)

    @pl.when(i == 0)
    def _():
        acc_ref[...] = jnp.zeros_like(acc_ref)

    x = x_ref[...].astype(jnp.float32)                           # (tm, E)
    h = _layernorm(x, ln_g_ref[...], ln_b_ref[...])
    logits = jnp.dot(h.astype(w_ref.dtype), w_ref[...],
                     preferred_element_type=jnp.float32) + b_ref[...]  # (tm, Vp)
    logits_ref[...] = logits.astype(logits_ref.dtype)

    tm, vp = logits.shape
    col = jax.lax.broadcasted_iota(jnp.int32, (tm, vp), 1)
    masked = jnp.where(col < vocab_size, logits, _NEG_INF)       # hide vocab padding
    m = jnp.max(masked, axis=-1, keepdims=True)
    lse = m + jnp.log(jnp.sum(jnp.exp(masked - m), axis=-1, keepdims=True))
    # picked logit via compare+select+reduce (no f32 one-hot materialization)
    picked = jnp.sum(jnp.where(col == tgt_ref[...], logits, 0.0),
                     axis=-1, keepdims=True)
    acc_ref[...] += jnp.sum(lse - picked, keepdims=True)
    loss_ref[...] = acc_ref[...] * (1.0 / n_tokens)


# ----------------------------- wrappers ------------------------------------


def run_transformer_block(x, p, num_heads):
    B, T, E = x.shape
    H = p["w1"].shape[1]
    full2 = lambda b: (0, 0)   # weights: constant block index -> resident, DMA'd once
    in_specs = [
        pl.BlockSpec((1, T, E), lambda b: (b, 0, 0)),            # x (per-batch tile)
        pl.BlockSpec((1, E), full2), pl.BlockSpec((1, E), full2),    # ln1 g/b
        pl.BlockSpec((E, 3 * E), full2),                             # wqkv (bf16)
        pl.BlockSpec((E, E), full2), pl.BlockSpec((1, E), full2),    # wp, bp
        pl.BlockSpec((1, E), full2), pl.BlockSpec((1, E), full2),    # ln2 g/b
        pl.BlockSpec((E, H), full2), pl.BlockSpec((1, H), full2),    # w1, b1
        pl.BlockSpec((H, E), full2), pl.BlockSpec((1, E), full2),    # w2, b2
    ]
    return pl.pallas_call(
        functools.partial(transformer_block_kernel, num_heads=num_heads),
        grid=(B,),
        in_specs=in_specs,
        out_specs=pl.BlockSpec((1, T, E), lambda b: (b, 0, 0)),
        out_shape=jax.ShapeDtypeStruct(x.shape, x.dtype),
        compiler_params=pltpu.CompilerParams(
            dimension_semantics=("parallel",),     # batch shards across TCs on v7x
            vmem_limit_bytes=_VMEM_LIMIT,
        ),
    )(x, p["ln1_g"], p["ln1_b"], p["wqkv"], p["wp"], p["bp"],
      p["ln2_g"], p["ln2_b"], p["w1"], p["b1"], p["w2"], p["b2"])


def run_lm_head_loss(x2d, tgt2d, params, vocab_size):
    N, E = x2d.shape
    Vp = params["w_lm"].shape[1]                  # vocab padded to multiple of 128
    tm = 8 if N % 8 == 0 else N                   # token-row tile
    full2 = lambda i: (0, 0)
    logits_p, loss = pl.pallas_call(
        functools.partial(lm_head_loss_kernel, vocab_size=vocab_size, n_tokens=N),
        grid=(N // tm,),
        in_specs=[
            pl.BlockSpec((tm, E), lambda i: (i, 0)),   # x rows
            pl.BlockSpec((tm, 1), lambda i: (i, 0)),   # targets
            pl.BlockSpec((1, E), full2),               # ln gamma
            pl.BlockSpec((1, E), full2),               # ln beta
            pl.BlockSpec((E, Vp), full2),              # w_lm (bf16, padded)
            pl.BlockSpec((1, Vp), full2),              # b_lm (padded)
        ],
        out_specs=(
            pl.BlockSpec((tm, Vp), lambda i: (i, 0)),  # lane-dense padded logits
            pl.BlockSpec((1, 1), full2),               # loss (resident accumulator)
        ),
        out_shape=(
            jax.ShapeDtypeStruct((N, Vp), x2d.dtype),
            jax.ShapeDtypeStruct((1, 1), jnp.float32),
        ),
        scratch_shapes=[pltpu.VMEM((1, 1), jnp.float32)],
        compiler_params=pltpu.CompilerParams(
            dimension_semantics=("arbitrary",),        # loss accumulates across tiles
            vmem_limit_bytes=_VMEM_LIMIT,
        ),
    )(x2d, tgt2d, params["ln_g"], params["ln_b"], params["w_lm"], params["b_lm"])
    return logits_p, loss[0, 0]


def gpt_forward(idx, params, cfg, targets=None):
    """Mirrors GPTLikeLanguageModel.forward (dropout = identity / eval mode)."""
    B, T = idx.shape
    V = cfg["vocab_size"]
    # token/position embedding gathers stay in plain JAX (glue around the kernels)
    x = params["tok_table"][idx] + params["pos_table"][:T][None, :, :]
    for blk in params["blocks"]:
        x = run_transformer_block(x, blk, cfg["num_heads"])
    x2d = x.reshape(B * T, -1)
    if targets is None:
        tgt2d = jnp.zeros((B * T, 1), jnp.int32)       # dummy; loss discarded
    else:
        tgt2d = targets.reshape(-1, 1).astype(jnp.int32)
    logits_p, loss = run_lm_head_loss(x2d, tgt2d, params, V)
    logits = logits_p[:, :V].reshape(B, T, V)          # strip vocab padding
    if targets is None:
        return logits, None
    return logits, loss


# -------------------------- pure-JAX reference ------------------------------


def _ref_forward(idx, params, cfg, targets=None):
    B, T = idx.shape
    E, nh, V = cfg["n_embedding"], cfg["num_heads"], cfg["vocab_size"]
    hs = E // nh
    f32 = jnp.float32
    x = params["tok_table"][idx] + params["pos_table"][:T][None]
    mask = jnp.tril(jnp.ones((T, T), bool))
    scale = E ** (-0.5)
    for p in params["blocks"]:
        h = _layernorm(x, p["ln1_g"], p["ln1_b"])
        qkv = jnp.einsum("bte,ef->btf", h.astype(jnp.bfloat16), p["wqkv"],
                         preferred_element_type=f32)
        heads = []
        for hd in range(nh):
            lo = hd * hs
            q = qkv[:, :, lo:lo + hs]
            k = qkv[:, :, E + lo:E + lo + hs]
            v = qkv[:, :, 2 * E + lo:2 * E + lo + hs]
            wei = jnp.einsum("btd,bsd->bts", q, k, preferred_element_type=f32) * scale
            wei = jnp.where(mask[None], wei, -jnp.inf)
            wei = jax.nn.softmax(wei, axis=-1)
            heads.append(jnp.einsum("bts,bsd->btd", wei, v, preferred_element_type=f32))
        att = jnp.einsum("bte,ef->btf",
                         jnp.concatenate(heads, -1).astype(jnp.bfloat16),
                         p["wp"], preferred_element_type=f32) + p["bp"]
        x2 = h + att
        h2 = _layernorm(x2, p["ln2_g"], p["ln2_b"])
        ff = jnp.maximum(
            jnp.einsum("bte,ef->btf", h2.astype(jnp.bfloat16), p["w1"],
                       preferred_element_type=f32) + p["b1"], 0.0)
        ff = jnp.einsum("btf,fe->bte", ff.astype(jnp.bfloat16), p["w2"],
                        preferred_element_type=f32) + p["b2"]
        x = h2 + ff
    h = _layernorm(x, params["ln_g"], params["ln_b"])
    logits = jnp.einsum("bte,ev->btv", h.astype(jnp.bfloat16),
                        params["w_lm"][:, :V],
                        preferred_element_type=f32) + params["b_lm"][:, :V]
    if targets is None:
        return logits, None
    lg = logits.reshape(B * T, V)
    tg = targets.reshape(-1)
    lse = jax.nn.logsumexp(lg, axis=-1)
    picked = jnp.take_along_axis(lg, tg[:, None], axis=-1)[:, 0]
    return logits, jnp.mean(lse - picked)


# ------------------------------ init ----------------------------------------


def init_params(key, cfg):
    V, E, C, nl = (cfg["vocab_size"], cfg["n_embedding"],
                   cfg["context_length"], cfg["num_layers"])
    Vp = _round_up(V, 128)                      # lane-dense lm_head output
    ks = iter(jax.random.split(key, 3 + 6 * nl))

    def nrm(k, shape, s=0.02):
        return jax.random.normal(k, shape, jnp.float32) * s

    params = {
        "tok_table": nrm(next(ks), (V, E), 1.0),
        "pos_table": nrm(next(ks), (C, E), 1.0),
        "ln_g": jnp.ones((1, E), jnp.float32),
        "ln_b": jnp.zeros((1, E), jnp.float32),
        # zero-padded vocab columns -> padded logits equal the (zero) bias
        "w_lm": jnp.pad(nrm(next(ks), (E, V)), ((0, 0), (0, Vp - V))).astype(jnp.bfloat16),
        "b_lm": jnp.zeros((1, Vp), jnp.float32),
        "blocks": [],
    }
    for _ in range(nl):
        wq = nrm(next(ks), (E, E))
        wk = nrm(next(ks), (E, E))
        wv = nrm(next(ks), (E, E))
        blk = {
            "ln1_g": jnp.ones((1, E), jnp.float32),
            "ln1_b": jnp.zeros((1, E), jnp.float32),
            "wqkv": jnp.concatenate([wq, wk, wv], axis=1).astype(jnp.bfloat16),
            "wp": nrm(next(ks), (E, E)).astype(jnp.bfloat16),
            "bp": jnp.zeros((1, E), jnp.float32),
            "ln2_g": jnp.ones((1, E), jnp.float32),
            "ln2_b": jnp.zeros((1, E), jnp.float32),
            "w1": nrm(next(ks), (E, 4 * E)).astype(jnp.bfloat16),
            "b1": jnp.zeros((1, 4 * E), jnp.float32),
            "w2": nrm(next(ks), (4 * E, E)).astype(jnp.bfloat16),
            "b2": jnp.zeros((1, E), jnp.float32),
        }
        params["blocks"].append(blk)
    return params


# ------------------------------ main -----------------------------------------

if __name__ == "__main__":
    cfg = dict(vocab_size=65, n_embedding=32, context_length=8,
               num_heads=4, num_layers=2, dropout=0.2)
    B, T = 2, 8

    key = jax.random.PRNGKey(0)
    k_param, k_idx, k_tgt = jax.random.split(key, 3)
    params = init_params(k_param, cfg)
    idx = jax.random.randint(k_idx, (B, T), 0, cfg["vocab_size"], jnp.int32)
    targets = jax.random.randint(k_tgt, (B, T), 0, cfg["vocab_size"], jnp.int32)

    fwd = jax.jit(lambda i, p, t: gpt_forward(i, p, cfg, targets=t))
    logits, loss = fwd(idx, params, targets)
    logits = jax.block_until_ready(logits)
    loss = jax.block_until_ready(loss)

    # sanity check against a pure-JAX reference of the same math (same bf16 casts)
    ref_logits, ref_loss = _ref_forward(idx, params, cfg, targets=targets)
    assert logits.shape == (B, T, cfg["vocab_size"])
    assert jnp.allclose(logits, ref_logits, atol=5e-3, rtol=5e-3), "logits mismatch"
    assert jnp.allclose(loss, ref_loss, atol=5e-3, rtol=5e-3), "loss mismatch"
    assert bool(jnp.isfinite(loss))

    print("KERNEL_OK")
</pallas_src>

<mosaic_0001>
module attributes {stable_mosaic.version = 11 : i64} {
  func.func @transformer_block_kernel(%arg0: i32, %arg1: memref<1x8x32xf32, #tpu.memory_space<vmem>>, %arg2: memref<1x32xf32, #tpu.memory_space<vmem>>, %arg3: memref<1x32xf32, #tpu.memory_space<vmem>>, %arg4: memref<32x96xbf16, #tpu.memory_space<vmem>>, %arg5: memref<32x32xbf16, #tpu.memory_space<vmem>>, %arg6: memref<1x32xf32, #tpu.memory_space<vmem>>, %arg7: memref<1x32xf32, #tpu.memory_space<vmem>>, %arg8: memref<1x32xf32, #tpu.memory_space<vmem>>, %arg9: memref<32x128xbf16, #tpu.memory_space<vmem>>, %arg10: memref<1x128xf32, #tpu.memory_space<vmem>>, %arg11: memref<128x32xbf16, #tpu.memory_space<vmem>>, %arg12: memref<1x32xf32, #tpu.memory_space<vmem>>, %arg13: memref<1x8x32xf32, #tpu.memory_space<vmem>>) attributes {dimension_semantics = [#tpu.dimension_semantics<parallel>], iteration_bounds = array<i64: 2>, scalar_prefetch = 0 : i64, scratch_operands = 0 : i64, tpu.core_type = #tpu.core_type<tc>, window_params = [{transform_indices = @transform_0, window_bounds = array<i64: 1, 8, 32>}, {pipeline_mode = #tpu.pipeline_mode<synchronous>, transform_indices = @transform_1, window_bounds = array<i64: 1, 32>}, {pipeline_mode = #tpu.pipeline_mode<synchronous>, transform_indices = @transform_2, window_bounds = array<i64: 1, 32>}, {pipeline_mode = #tpu.pipeline_mode<synchronous>, transform_indices = @transform_3, window_bounds = array<i64: 32, 96>}, {pipeline_mode = #tpu.pipeline_mode<synchronous>, transform_indices = @transform_4, window_bounds = array<i64: 32, 32>}, {pipeline_mode = #tpu.pipeline_mode<synchronous>, transform_indices = @transform_5, window_bounds = array<i64: 1, 32>}, {pipeline_mode = #tpu.pipeline_mode<synchronous>, transform_indices = @transform_6, window_bounds = array<i64: 1, 32>}, {pipeline_mode = #tpu.pipeline_mode<synchronous>, transform_indices = @transform_7, window_bounds = array<i64: 1, 32>}, {pipeline_mode = #tpu.pipeline_mode<synchronous>, transform_indices = @transform_8, window_bounds = array<i64: 32, 128>}, {pipeline_mode = #tpu.pipeline_mode<synchronous>, transform_indices = @transform_9, window_bounds = array<i64: 1, 128>}, {pipeline_mode = #tpu.pipeline_mode<synchronous>, transform_indices = @transform_10, window_bounds = array<i64: 128, 32>}, {pipeline_mode = #tpu.pipeline_mode<synchronous>, transform_indices = @transform_11, window_bounds = array<i64: 1, 32>}, {transform_indices = @transform_12, window_bounds = array<i64: 1, 8, 32>}]} {
    %c0 = arith.constant 0 : index
    %c0_0 = arith.constant 0 : index
    %c0_1 = arith.constant 0 : index
    %0 = vector.load %arg1[%c0, %c0_0, %c0_1] : memref<1x8x32xf32, #tpu.memory_space<vmem>>, vector<1x8x32xf32>
    %1 = vector.shape_cast %0 : vector<1x8x32xf32> to vector<8x32xf32>
    %c0_2 = arith.constant 0 : index
    %c0_3 = arith.constant 0 : index
    %2 = vector.load %arg2[%c0_2, %c0_3] : memref<1x32xf32, #tpu.memory_space<vmem>>, vector<1x32xf32>
    %c0_4 = arith.constant 0 : index
    %c0_5 = arith.constant 0 : index
    %3 = vector.load %arg3[%c0_4, %c0_5] : memref<1x32xf32, #tpu.memory_space<vmem>>, vector<1x32xf32>
    %cst = arith.constant dense<0.000000e+00> : vector<8xf32>
    %4 = vector.multi_reduction <add>, %1, %cst [1] : vector<8x32xf32> to vector<8xf32>
    %5 = vector.shape_cast %4 : vector<8xf32> to vector<8x1xf32>
    %cst_6 = arith.constant 3.200000e+01 : f32
    %6 = vector.broadcast %cst_6 : f32 to vector<8x1xf32>
    %7 = arith.divf %5, %6 : vector<8x1xf32>
    %8 = vector.broadcast %7 : vector<8x1xf32> to vector<8x32xf32>
    %9 = arith.subf %1, %8 : vector<8x32xf32>
    %10 = arith.mulf %9, %9 : vector<8x32xf32>
    %cst_7 = arith.constant dense<0.000000e+00> : vector<8xf32>
    %11 = vector.multi_reduction <add>, %10, %cst_7 [1] : vector<8x32xf32> to vector<8xf32>
    %12 = vector.shape_cast %11 : vector<8xf32> to vector<8x1xf32>
    %cst_8 = arith.constant 3.200000e+01 : f32
    %13 = vector.broadcast %cst_8 : f32 to vector<8x1xf32>
    %14 = arith.divf %12, %13 : vector<8x1xf32>
    %15 = vector.broadcast %7 : vector<8x1xf32> to vector<8x32xf32>
    %16 = arith.subf %1, %15 : vector<8x32xf32>
    %cst_9 = arith.constant 9.99999974E-6 : f32
    %17 = vector.broadcast %cst_9 : f32 to vector<8x1xf32>
    %18 = arith.addf %14, %17 : vector<8x1xf32>
    %19 = math.rsqrt %18 : vector<8x1xf32>
    %20 = vector.broadcast %19 : vector<8x1xf32> to vector<8x32xf32>
    %21 = arith.mulf %16, %20 : vector<8x32xf32>
    %22 = vector.broadcast %2 : vector<1x32xf32> to vector<8x32xf32>
    %23 = arith.mulf %21, %22 : vector<8x32xf32>
    %24 = vector.broadcast %3 : vector<1x32xf32> to vector<8x32xf32>
    %25 = arith.addf %23, %24 : vector<8x32xf32>
    %26 = arith.truncf %25 : vector<8x32xf32> to vector<8x32xbf16>
    %c0_10 = arith.constant 0 : index
    %c0_11 = arith.constant 0 : index
    %27 = vector.load %arg4[%c0_10, %c0_11] : memref<32x96xbf16, #tpu.memory_space<vmem>>, vector<32x96xbf16>
    %cst_12 = arith.constant dense<0.000000e+00> : vector<8x96xf32>
    %28 = tpu.matmul %26, %27, %cst_12 {dimension_numbers = #tpu.dot_dimension_numbers<[1], [0], [0], [1], [0, 0, 1, 1], [], []>} : vector<8x32xbf16>, vector<32x96xbf16>, vector<8x96xf32> -> vector<8x96xf32>
    %29 = tpu.iota {dimensions = array<i32: 0>} : vector<8x8xi32>
    %30 = tpu.iota {dimensions = array<i32: 1>} : vector<8x8xi32>
    %31 = arith.cmpi sge, %29, %30 : vector<8x8xi32>
    %cst_13 = arith.constant 0.000000e+00 : f32
    %cst_14 = arith.constant -1.000000e+30 : f32
    %32 = vector.broadcast %cst_13 : f32 to vector<8x8xf32>
    %33 = vector.broadcast %cst_14 : f32 to vector<8x8xf32>
    %34 = arith.select %31, %32, %33 : vector<8x8xi1>, vector<8x8xf32>
    %35 = vector.extract_strided_slice %28 {offsets = [0, 0], sizes = [8, 8], strides = [1, 1]} : vector<8x96xf32> to vector<8x8xf32>
    %36 = vector.extract_strided_slice %28 {offsets = [0, 32], sizes = [8, 8], strides = [1, 1]} : vector<8x96xf32> to vector<8x8xf32>
    %37 = vector.extract_strided_slice %28 {offsets = [0, 64], sizes = [8, 8], strides = [1, 1]} : vector<8x96xf32> to vector<8x8xf32>
    %cst_15 = arith.constant dense<0.000000e+00> : vector<8x8xf32>
    %38 = tpu.matmul %35, %36, %cst_15 {dimension_numbers = #tpu.dot_dimension_numbers<[1], [1], [0], [0], [0, 0, 1, 0], [], []>} : vector<8x8xf32>, vector<8x8xf32>, vector<8x8xf32> -> vector<8x8xf32>
    %cst_16 = arith.constant 0.176776692 : f32
    %39 = vector.broadcast %cst_16 : f32 to vector<8x8xf32>
    %40 = arith.mulf %38, %39 : vector<8x8xf32>
    %41 = arith.addf %40, %34 : vector<8x8xf32>
    %cst_17 = arith.constant dense<0xFF800000> : vector<8xf32>
    %42 = vector.multi_reduction <maximumf>, %41, %cst_17 [1] : vector<8x8xf32> to vector<8xf32>
    %43 = vector.shape_cast %42 : vector<8xf32> to vector<8x1xf32>
    %44 = vector.broadcast %43 : vector<8x1xf32> to vector<8x8xf32>
    %45 = arith.subf %41, %44 : vector<8x8xf32>
    %46 = math.exp %45 : vector<8x8xf32>
    %cst_18 = arith.constant dense<0.000000e+00> : vector<8xf32>
    %47 = vector.multi_reduction <add>, %46, %cst_18 [1] : vector<8x8xf32> to vector<8xf32>
    %48 = vector.shape_cast %47 : vector<8xf32> to vector<8x1xf32>
    %49 = tpu.reciprocal %48 {approx = true} : vector<8x1xf32> -> vector<8x1xf32>
    %50 = vector.broadcast %49 : vector<8x1xf32> to vector<8x8xf32>
    %51 = arith.mulf %46, %50 : vector<8x8xf32>
    %cst_19 = arith.constant dense<0.000000e+00> : vector<8x8xf32>
    %52 = tpu.matmul %51, %37, %cst_19 {dimension_numbers = #tpu.dot_dimension_numbers<[1], [0], [0], [1], [0, 0, 1, 1], [], []>} : vector<8x8xf32>, vector<8x8xf32>, vector<8x8xf32> -> vector<8x8xf32>
    %53 = vector.extract_strided_slice %28 {offsets = [0, 8], sizes = [8, 8], strides = [1, 1]} : vector<8x96xf32> to vector<8x8xf32>
    %54 = vector.extract_strided_slice %28 {offsets = [0, 40], sizes = [8, 8], strides = [1, 1]} : vector<8x96xf32> to vector<8x8xf32>
    %55 = vector.extract_strided_slice %28 {offsets = [0, 72], sizes = [8, 8], strides = [1, 1]} : vector<8x96xf32> to vector<8x8xf32>
    %cst_20 = arith.constant dense<0.000000e+00> : vector<8x8xf32>
    %56 = tpu.matmul %53, %54, %cst_20 {dimension_numbers = #tpu.dot_dimension_numbers<[1], [1], [0], [0], [0, 0, 1, 0], [], []>} : vector<8x8xf32>, vector<8x8xf32>, vector<8x8xf32> -> vector<8x8xf32>
    %cst_21 = arith.constant 0.176776692 : f32
    %57 = vector.broadcast %cst_21 : f32 to vector<8x8xf32>
    %58 = arith.mulf %56, %57 : vector<8x8xf32>
    %59 = arith.addf %58, %34 : vector<8x8xf32>
    %cst_22 = arith.constant dense<0xFF800000> : vector<8xf32>
    %60 = vector.multi_reduction <maximumf>, %59, %cst_22 [1] : vector<8x8xf32> to vector<8xf32>
    %61 = vector.shape_cast %60 : vector<8xf32> to vector<8x1xf32>
    %62 = vector.broadcast %61 : vector<8x1xf32> to vector<8x8xf32>
    %63 = arith.subf %59, %62 : vector<8x8xf32>
    %64 = math.exp %63 : vector<8x8xf32>
    %cst_23 = arith.constant dense<0.000000e+00> : vector<8xf32>
    %65 = vector.multi_reduction <add>, %64, %cst_23 [1] : vector<8x8xf32> to vector<8xf32>
    %66 = vector.shape_cast %65 : vector<8xf32> to vector<8x1xf32>
    %67 = tpu.reciprocal %66 {approx = true} : vector<8x1xf32> -> vector<8x1xf32>
    %68 = vector.broadcast %67 : vector<8x1xf32> to vector<8x8xf32>
    %69 = arith.mulf %64, %68 : vector<8x8xf32>
    %cst_24 = arith.constant dense<0.000000e+00> : vector<8x8xf32>
    %70 = tpu.matmul %69, %55, %cst_24 {dimension_numbers = #tpu.dot_dimension_numbers<[1], [0], [0], [1], [0, 0, 1, 1], [], []>} : vector<8x8xf32>, vector<8x8xf32>, vector<8x8xf32> -> vector<8x8xf32>
    %71 = vector.extract_strided_slice %28 {offsets = [0, 16], sizes = [8, 8], strides = [1, 1]} : vector<8x96xf32> to vector<8x8xf32>
    %72 = vector.extract_strided_slice %28 {offsets = [0, 48], sizes = [8, 8], strides = [1, 1]} : vector<8x96xf32> to vector<8x8xf32>
    %73 = vector.extract_strided_slice %28 {offsets = [0, 80], sizes = [8, 8], strides = [1, 1]} : vector<8x96xf32> to vector<8x8xf32>
    %cst_25 = arith.constant dense<0.000000e+00> : vector<8x8xf32>
    %74 = tpu.matmul %71, %72, %cst_25 {dimension_numbers = #tpu.dot_dimension_numbers<[1], [1], [0], [0], [0, 0, 1, 0], [], []>} : vector<8x8xf32>, vector<8x8xf32>, vector<8x8xf32> -> vector<8x8xf32>
    %cst_26 = arith.constant 0.176776692 : f32
    %75 = vector.broadcast %cst_26 : f32 to vector<8x8xf32>
    %76 = arith.mulf %74, %75 : vector<8x8xf32>
    %77 = arith.addf %76, %34 : vector<8x8xf32>
    %cst_27 = arith.constant dense<0xFF800000> : vector<8xf32>
    %78 = vector.multi_reduction <maximumf>, %77, %cst_27 [1] : vector<8x8xf32> to vector<8xf32>
    %79 = vector.shape_cast %78 : vector<8xf32> to vector<8x1xf32>
    %80 = vector.broadcast %79 : vector<8x1xf32> to vector<8x8xf32>
    %81 = arith.subf %77, %80 : vector<8x8xf32>
    %82 = math.exp %81 : vector<8x8xf32>
    %cst_28 = arith.constant dense<0.000000e+00> : vector<8xf32>
    %83 = vector.multi_reduction <add>, %82, %cst_28 [1] : vector<8x8xf32> to vector<8xf32>
    %84 = vector.shape_cast %83 : vector<8xf32> to vector<8x1xf32>
    %85 = tpu.reciprocal %84 {approx = true} : vector<8x1xf32> -> vector<8x1xf32>
    %86 = vector.broadcast %85 : vector<8x1xf32> to vector<8x8xf32>
    %87 = arith.mulf %82, %86 : vector<8x8xf32>
    %cst_29 = arith.constant dense<0.000000e+00> : vector<8x8xf32>
    %88 = tpu.matmul %87, %73, %cst_29 {dimension_numbers = #tpu.dot_dimension_numbers<[1], [0], [0], [1], [0, 0, 1, 1], [], []>} : vector<8x8xf32>, vector<8x8xf32>, vector<8x8xf32> -> vector<8x8xf32>
    %89 = vector.extract_strided_slice %28 {offsets = [0, 24], sizes = [8, 8], strides = [1, 1]} : vector<8x96xf32> to vector<8x8xf32>
    %90 = vector.extract_strided_slice %28 {offsets = [0, 56], sizes = [8, 8], strides = [1, 1]} : vector<8x96xf32> to vector<8x8xf32>
    %91 = vector.extract_strided_slice %28 {offsets = [0, 88], sizes = [8, 8], strides = [1, 1]} : vector<8x96xf32> to vector<8x8xf32>
    %cst_30 = arith.constant dense<0.000000e+00> : vector<8x8xf32>
    %92 = tpu.matmul %89, %90, %cst_30 {dimension_numbers = #tpu.dot_dimension_numbers<[1], [1], [0], [0], [0, 0, 1, 0], [], []>} : vector<8x8xf32>, vector<8x8xf32>, vector<8x8xf32> -> vector<8x8xf32>
    %cst_31 = arith.constant 0.176776692 : f32
    %93 = vector.broadcast %cst_31 : f32 to vector<8x8xf32>
    %94 = arith.mulf %92, %93 : vector<8x8xf32>
    %95 = arith.addf %94, %34 : vector<8x8xf32>
    %cst_32 = arith.constant dense<0xFF800000> : vector<8xf32>
    %96 = vector.multi_reduction <maximumf>, %95, %cst_32 [1] : vector<8x8xf32> to vector<8xf32>
    %97 = vector.shape_cast %96 : vector<8xf32> to vector<8x1xf32>
    %98 = vector.broadcast %97 : vector<8x1xf32> to vector<8x8xf32>
    %99 = arith.subf %95, %98 : vector<8x8xf32>
    %100 = math.exp %99 : vector<8x8xf32>
    %cst_33 = arith.constant dense<0.000000e+00> : vector<8xf32>
    %101 = vector.multi_reduction <add>, %100, %cst_33 [1] : vector<8x8xf32> to vector<8xf32>
    %102 = vector.shape_cast %101 : vector<8xf32> to vector<8x1xf32>
    %103 = tpu.reciprocal %102 {approx = true} : vector<8x1xf32> -> vector<8x1xf32>
    %104 = vector.broadcast %103 : vector<8x1xf32> to vector<8x8xf32>
    %105 = arith.mulf %100, %104 : vector<8x8xf32>
    %cst_34 = arith.constant dense<0.000000e+00> : vector<8x8xf32>
    %106 = tpu.matmul %105, %91, %cst_34 {dimension_numbers = #tpu.dot_dimension_numbers<[1], [0], [0], [1], [0, 0, 1, 1], [], []>} : vector<8x8xf32>, vector<8x8xf32>, vector<8x8xf32> -> vector<8x8xf32>
    %107 = tpu.concatenate %52, %70, %88, %106 in 1 : vector<8x8xf32>, vector<8x8xf32>, vector<8x8xf32>, vector<8x8xf32> -> vector<8x32xf32>
    %108 = arith.truncf %107 : vector<8x32xf32> to vector<8x32xbf16>
    %c0_35 = arith.constant 0 : index
    %c0_36 = arith.constant 0 : index
    %109 = vector.load %arg5[%c0_35, %c0_36] : memref<32x32xbf16, #tpu.memory_space<vmem>>, vector<32x32xbf16>
    %cst_37 = arith.constant dense<0.000000e+00> : vector<8x32xf32>
    %110 = tpu.matmul %108, %109, %cst_37 {dimension_numbers = #tpu.dot_dimension_numbers<[1], [0], [0], [1], [0, 0, 1, 1], [], []>} : vector<8x32xbf16>, vector<32x32xbf16>, vector<8x32xf32> -> vector<8x32xf32>
    %c0_38 = arith.constant 0 : index
    %c0_39 = arith.constant 0 : index
    %111 = vector.load %arg6[%c0_38, %c0_39] : memref<1x32xf32, #tpu.memory_space<vmem>>, vector<1x32xf32>
    %112 = vector.broadcast %111 : vector<1x32xf32> to vector<8x32xf32>
    %113 = arith.addf %110, %112 : vector<8x32xf32>
    %114 = arith.addf %25, %113 : vector<8x32xf32>
    %c0_40 = arith.constant 0 : index
    %c0_41 = arith.constant 0 : index
    %115 = vector.load %arg7[%c0_40, %c0_41] : memref<1x32xf32, #tpu.memory_space<vmem>>, vector<1x32xf32>
    %c0_42 = arith.constant 0 : index
    %c0_43 = arith.constant 0 : index
    %116 = vector.load %arg8[%c0_42, %c0_43] : memref<1x32xf32, #tpu.memory_space<vmem>>, vector<1x32xf32>
    %cst_44 = arith.constant dense<0.000000e+00> : vector<8xf32>
    %117 = vector.multi_reduction <add>, %114, %cst_44 [1] : vector<8x32xf32> to vector<8xf32>
    %118 = vector.shape_cast %117 : vector<8xf32> to vector<8x1xf32>
    %cst_45 = arith.constant 3.200000e+01 : f32
    %119 = vector.broadcast %cst_45 : f32 to vector<8x1xf32>
    %120 = arith.divf %118, %119 : vector<8x1xf32>
    %121 = vector.broadcast %120 : vector<8x1xf32> to vector<8x32xf32>
    %122 = arith.subf %114, %121 : vector<8x32xf32>
    %123 = arith.mulf %122, %122 : vector<8x32xf32>
    %cst_46 = arith.constant dense<0.000000e+00> : vector<8xf32>
    %124 = vector.multi_reduction <add>, %123, %cst_46 [1] : vector<8x32xf32> to vector<8xf32>
    %125 = vector.shape_cast %124 : vector<8xf32> to vector<8x1xf32>
    %cst_47 = arith.constant 3.200000e+01 : f32
    %126 = vector.broadcast %cst_47 : f32 to vector<8x1xf32>
    %127 = arith.divf %125, %126 : vector<8x1xf32>
    %128 = vector.broadcast %120 : vector<8x1xf32> to vector<8x32xf32>
    %129 = arith.subf %114, %128 : vector<8x32xf32>
    %cst_48 = arith.constant 9.99999974E-6 : f32
    %130 = vector.broadcast %cst_48 : f32 to vector<8x1xf32>
    %131 = arith.addf %127, %130 : vector<8x1xf32>
    %132 = math.rsqrt %131 : vector<8x1xf32>
    %133 = vector.broadcast %132 : vector<8x1xf32> to vector<8x32xf32>
    %134 = arith.mulf %129, %133 : vector<8x32xf32>
    %135 = vector.broadcast %115 : vector<1x32xf32> to vector<8x32xf32>
    %136 = arith.mulf %134, %135 : vector<8x32xf32>
    %137 = vector.broadcast %116 : vector<1x32xf32> to vector<8x32xf32>
    %138 = arith.addf %136, %137 : vector<8x32xf32>
    %139 = arith.truncf %138 : vector<8x32xf32> to vector<8x32xbf16>
    %c0_49 = arith.constant 0 : index
    %c0_50 = arith.constant 0 : index
    %140 = vector.load %arg9[%c0_49, %c0_50] : memref<32x128xbf16, #tpu.memory_space<vmem>>, vector<32x128xbf16>
    %cst_51 = arith.constant dense<0.000000e+00> : vector<8x128xf32>
    %141 = tpu.matmul %139, %140, %cst_51 {dimension_numbers = #tpu.dot_dimension_numbers<[1], [0], [0], [1], [0, 0, 1, 1], [], []>} : vector<8x32xbf16>, vector<32x128xbf16>, vector<8x128xf32> -> vector<8x128xf32>
    %c0_52 = arith.constant 0 : index
    %c0_53 = arith.constant 0 : index
    %142 = vector.load %arg10[%c0_52, %c0_53] : memref<1x128xf32, #tpu.memory_space<vmem>>, vector<1x128xf32>
    %143 = vector.broadcast %142 : vector<1x128xf32> to vector<8x128xf32>
    %144 = arith.addf %141, %143 : vector<8x128xf32>
    %cst_54 = arith.constant 0.000000e+00 : f32
    %145 = vector.broadcast %cst_54 : f32 to vector<8x128xf32>
    %146 = arith.maximumf %144, %145 : vector<8x128xf32>
    %147 = arith.truncf %146 : vector<8x128xf32> to vector<8x128xbf16>
    %c0_55 = arith.constant 0 : index
    %c0_56 = arith.constant 0 : index
    %148 = vector.load %arg11[%c0_55, %c0_56] : memref<128x32xbf16, #tpu.memory_space<vmem>>, vector<128x32xbf16>
    %cst_57 = arith.constant dense<0.000000e+00> : vector<8x32xf32>
    %149 = tpu.matmul %147, %148, %cst_57 {dimension_numbers = #tpu.dot_dimension_numbers<[1], [0], [0], [1], [0, 0, 1, 1], [], []>} : vector<8x128xbf16>, vector<128x32xbf16>, vector<8x32xf32> -> vector<8x32xf32>
    %c0_58 = arith.constant 0 : index
    %c0_59 = arith.constant 0 : index
    %150 = vector.load %arg12[%c0_58, %c0_59] : memref<1x32xf32, #tpu.memory_space<vmem>>, vector<1x32xf32>
    %151 = vector.broadcast %150 : vector<1x32xf32> to vector<8x32xf32>
    %152 = arith.addf %149, %151 : vector<8x32xf32>
    %153 = arith.addf %138, %152 : vector<8x32xf32>
    %c0_60 = arith.constant 0 : index
    %c0_61 = arith.constant 0 : index
    %c0_62 = arith.constant 0 : index
    %154 = vector.load %arg13[%c0_60, %c0_61, %c0_62] : memref<1x8x32xf32, #tpu.memory_space<vmem>>, vector<1x8x32xf32>
    %155 = vector.shape_cast %154 : vector<1x8x32xf32> to vector<8x32xf32>
    %156 = vector.shape_cast %153 : vector<8x32xf32> to vector<1x8x32xf32>
    tpu.vector_store %arg13[%c0_60, %c0_61, %c0_62], %156 {strides = array<i32>} : memref<1x8x32xf32, #tpu.memory_space<vmem>>, vector<1x8x32xf32>,
    return
  }
  func.func @transform_0(%arg0: i32) -> (i32, i32, i32) {
    %c0_i32 = arith.constant 0 : i32
    %c0_i32_0 = arith.constant 0 : i32
    %c0_i32_1 = arith.constant 0 : i32
    return %arg0, %c0_i32, %c0_i32_0 : i32, i32, i32
  }
  func.func @transform_1(%arg0: i32) -> (i32, i32) {
    %c0_i32 = arith.constant 0 : i32
    %c0_i32_0 = arith.constant 0 : i32
    %c0_i32_1 = arith.constant 0 : i32
    return %c0_i32, %c0_i32_0 : i32, i32
  }
  func.func @transform_2(%arg0: i32) -> (i32, i32) {
    %c0_i32 = arith.constant 0 : i32
    %c0_i32_0 = arith.constant 0 : i32
    %c0_i32_1 = arith.constant 0 : i32
    return %c0_i32, %c0_i32_0 : i32, i32
  }
  func.func @transform_3(%arg0: i32) -> (i32, i32) {
    %c0_i32 = arith.constant 0 : i32
    %c0_i32_0 = arith.constant 0 : i32
    %c0_i32_1 = arith.constant 0 : i32
    return %c0_i32, %c0_i32_0 : i32, i32
  }
  func.func @transform_4(%arg0: i32) -> (i32, i32) {
    %c0_i32 = arith.constant 0 : i32
    %c0_i32_0 = arith.constant 0 : i32
    %c0_i32_1 = arith.constant 0 : i32
    return %c0_i32, %c0_i32_0 : i32, i32
  }
  func.func @transform_5(%arg0: i32) -> (i32, i32) {
    %c0_i32 = arith.constant 0 : i32
    %c0_i32_0 = arith.constant 0 : i32
    %c0_i32_1 = arith.constant 0 : i32
    return %c0_i32, %c0_i32_0 : i32, i32
  }
  func.func @transform_6(%arg0: i32) -> (i32, i32) {
    %c0_i32 = arith.constant 0 : i32
    %c0_i32_0 = arith.constant 0 : i32
    %c0_i32_1 = arith.constant 0 : i32
    return %c0_i32, %c0_i32_0 : i32, i32
  }
  func.func @transform_7(%arg0: i32) -> (i32, i32) {
    %c0_i32 = arith.constant 0 : i32
    %c0_i32_0 = arith.constant 0 : i32
    %c0_i32_1 = arith.constant 0 : i32
    return %c0_i32, %c0_i32_0 : i32, i32
  }
  func.func @transform_8(%arg0: i32) -> (i32, i32) {
    %c0_i32 = arith.constant 0 : i32
    %c0_i32_0 = arith.constant 0 : i32
    %c0_i32_1 = arith.constant 0 : i32
    return %c0_i32, %c0_i32_0 : i32, i32
  }
  func.func @transform_9(%arg0: i32) -> (i32, i32) {
    %c0_i32 = arith.constant 0 : i32
    %c0_i32_0 = arith.constant 0 : i32
    %c0_i32_1 = arith.constant 0 : i32
    return %c0_i32, %c0_i32_0 : i32, i32
  }
  func.func @transform_10(%arg0: i32) -> (i32, i32) {
    %c0_i32 = arith.constant 0 : i32
    %c0_i32_0 = arith.constant 0 : i32
    %c0_i32_1 = arith.constant 0 : i32
    return %c0_i32, %c0_i32_0 : i32, i32
  }
  func.func @transform_11(%arg0: i32) -> (i32, i32) {
    %c0_i32 = arith.constant 0 : i32
    %c0_i32_0 = arith.constant 0 : i32
    %c0_i32_1 = arith.constant 0 : i32
    return %c0_i32, %c0_i32_0 : i32, i32
  }
  func.func @transform_12(%arg0: i32) -> (i32, i32, i32) {
    %c0_i32 = arith.constant 0 : i32
    %c0_i32_0 = arith.constant 0 : i32
    %c0_i32_1 = arith.constant 0 : i32
    return %arg0, %c0_i32, %c0_i32_0 : i32, i32, i32
  }
}

module attributes {stable_mosaic.version = 11 : i64} {
  func.func @lm_head_loss_kernel(%arg0: i32, %arg1: memref<8x32xf32, #tpu.memory_space<vmem>>, %arg2: memref<8x1xi32, #tpu.memory_space<vmem>>, %arg3: memref<1x32xf32, #tpu.memory_space<vmem>>, %arg4: memref<1x32xf32, #tpu.memory_space<vmem>>, %arg5: memref<32x128xbf16, #tpu.memory_space<vmem>>, %arg6: memref<1x128xf32, #tpu.memory_space<vmem>>, %arg7: memref<8x128xf32, #tpu.memory_space<vmem>>, %arg8: memref<1x1xf32, #tpu.memory_space<vmem>>, %arg9: memref<1x1xf32, #tpu.memory_space<vmem>>) attributes {dimension_semantics = [#tpu.dimension_semantics<arbitrary>], iteration_bounds = array<i64: 2>, scalar_prefetch = 0 : i64, scratch_operands = 1 : i64, tpu.core_type = #tpu.core_type<tc>, window_params = [{transform_indices = @transform_0, window_bounds = array<i64: 8, 32>}, {transform_indices = @transform_1, window_bounds = array<i64: 8, 1>}, {pipeline_mode = #tpu.pipeline_mode<synchronous>, transform_indices = @transform_2, window_bounds = array<i64: 1, 32>}, {pipeline_mode = #tpu.pipeline_mode<synchronous>, transform_indices = @transform_3, window_bounds = array<i64: 1, 32>}, {pipeline_mode = #tpu.pipeline_mode<synchronous>, transform_indices = @transform_4, window_bounds = array<i64: 32, 128>}, {pipeline_mode = #tpu.pipeline_mode<synchronous>, transform_indices = @transform_5, window_bounds = array<i64: 1, 128>}, {transform_indices = @transform_6, window_bounds = array<i64: 8, 128>}, {pipeline_mode = #tpu.pipeline_mode<synchronous>, transform_indices = @transform_7, window_bounds = array<i64: 1, 1>}]} {
    %c0_i32 = arith.constant 0 : i32
    %0 = arith.cmpi eq, %arg0, %c0_i32 : i32
    %1 = arith.extui %0 : i1 to i32
    %c0_i32_0 = arith.constant 0 : i32
    %2 = arith.cmpi ne, %1, %c0_i32_0 : i32
    scf.if %2 {
      %cst_34 = arith.constant 0.000000e+00 : f32
      %69 = vector.broadcast %cst_34 : f32 to vector<1x1xf32>
      %c0_35 = arith.constant 0 : index
      %c0_36 = arith.constant 0 : index
      %70 = vector.load %arg9[%c0_35, %c0_36] : memref<1x1xf32, #tpu.memory_space<vmem>>, vector<1x1xf32>
      tpu.vector_store %arg9[%c0_35, %c0_36], %69 {strides = array<i32>} : memref<1x1xf32, #tpu.memory_space<vmem>>, vector<1x1xf32>,
    } else {
    }
    %c0 = arith.constant 0 : index
    %c0_1 = arith.constant 0 : index
    %3 = vector.load %arg1[%c0, %c0_1] : memref<8x32xf32, #tpu.memory_space<vmem>>, vector<8x32xf32>
    %c0_2 = arith.constant 0 : index
    %c0_3 = arith.constant 0 : index
    %4 = vector.load %arg3[%c0_2, %c0_3] : memref<1x32xf32, #tpu.memory_space<vmem>>, vector<1x32xf32>
    %c0_4 = arith.constant 0 : index
    %c0_5 = arith.constant 0 : index
    %5 = vector.load %arg4[%c0_4, %c0_5] : memref<1x32xf32, #tpu.memory_space<vmem>>, vector<1x32xf32>
    %cst = arith.constant dense<0.000000e+00> : vector<8xf32>
    %6 = vector.multi_reduction <add>, %3, %cst [1] : vector<8x32xf32> to vector<8xf32>
    %7 = vector.shape_cast %6 : vector<8xf32> to vector<8x1xf32>
    %cst_6 = arith.constant 3.200000e+01 : f32
    %8 = vector.broadcast %cst_6 : f32 to vector<8x1xf32>
    %9 = arith.divf %7, %8 : vector<8x1xf32>
    %10 = vector.broadcast %9 : vector<8x1xf32> to vector<8x32xf32>
    %11 = arith.subf %3, %10 : vector<8x32xf32>
    %12 = arith.mulf %11, %11 : vector<8x32xf32>
    %cst_7 = arith.constant dense<0.000000e+00> : vector<8xf32>
    %13 = vector.multi_reduction <add>, %12, %cst_7 [1] : vector<8x32xf32> to vector<8xf32>
    %14 = vector.shape_cast %13 : vector<8xf32> to vector<8x1xf32>
    %cst_8 = arith.constant 3.200000e+01 : f32
    %15 = vector.broadcast %cst_8 : f32 to vector<8x1xf32>
    %16 = arith.divf %14, %15 : vector<8x1xf32>
    %17 = vector.broadcast %9 : vector<8x1xf32> to vector<8x32xf32>
    %18 = arith.subf %3, %17 : vector<8x32xf32>
    %cst_9 = arith.constant 9.99999974E-6 : f32
    %19 = vector.broadcast %cst_9 : f32 to vector<8x1xf32>
    %20 = arith.addf %16, %19 : vector<8x1xf32>
    %21 = math.rsqrt %20 : vector<8x1xf32>
    %22 = vector.broadcast %21 : vector<8x1xf32> to vector<8x32xf32>
    %23 = arith.mulf %18, %22 : vector<8x32xf32>
    %24 = vector.broadcast %4 : vector<1x32xf32> to vector<8x32xf32>
    %25 = arith.mulf %23, %24 : vector<8x32xf32>
    %26 = vector.broadcast %5 : vector<1x32xf32> to vector<8x32xf32>
    %27 = arith.addf %25, %26 : vector<8x32xf32>
    %28 = arith.truncf %27 : vector<8x32xf32> to vector<8x32xbf16>
    %c0_10 = arith.constant 0 : index
    %c0_11 = arith.constant 0 : index
    %29 = vector.load %arg5[%c0_10, %c0_11] : memref<32x128xbf16, #tpu.memory_space<vmem>>, vector<32x128xbf16>
    %cst_12 = arith.constant dense<0.000000e+00> : vector<8x128xf32>
    %30 = tpu.matmul %28, %29, %cst_12 {dimension_numbers = #tpu.dot_dimension_numbers<[1], [0], [0], [1], [0, 0, 1, 1], [], []>} : vector<8x32xbf16>, vector<32x128xbf16>, vector<8x128xf32> -> vector<8x128xf32>
    %c0_13 = arith.constant 0 : index
    %c0_14 = arith.constant 0 : index
    %31 = vector.load %arg6[%c0_13, %c0_14] : memref<1x128xf32, #tpu.memory_space<vmem>>, vector<1x128xf32>
    %32 = vector.broadcast %31 : vector<1x128xf32> to vector<8x128xf32>
    %33 = arith.addf %30, %32 : vector<8x128xf32>
    %c0_15 = arith.constant 0 : index
    %c0_16 = arith.constant 0 : index
    %34 = vector.load %arg7[%c0_15, %c0_16] : memref<8x128xf32, #tpu.memory_space<vmem>>, vector<8x128xf32>
    tpu.vector_store %arg7[%c0_15, %c0_16], %33 {strides = array<i32>} : memref<8x128xf32, #tpu.memory_space<vmem>>, vector<8x128xf32>,
    %35 = tpu.iota {dimensions = array<i32: 1>} : vector<8x128xi32>
    %c65_i32 = arith.constant 65 : i32
    %36 = vector.broadcast %c65_i32 : i32 to vector<8x128xi32>
    %37 = arith.cmpi slt, %35, %36 : vector<8x128xi32>
    %cst_17 = arith.constant -1.000000e+30 : f32
    %38 = vector.broadcast %cst_17 : f32 to vector<8x128xf32>
    %39 = arith.select %37, %33, %38 : vector<8x128xi1>, vector<8x128xf32>
    %cst_18 = arith.constant dense<0xFF800000> : vector<8xf32>
    %40 = vector.multi_reduction <maximumf>, %39, %cst_18 [1] : vector<8x128xf32> to vector<8xf32>
    %41 = vector.shape_cast %40 : vector<8xf32> to vector<8x1xf32>
    %42 = vector.broadcast %41 : vector<8x1xf32> to vector<8x128xf32>
    %43 = arith.subf %39, %42 : vector<8x128xf32>
    %44 = math.exp %43 : vector<8x128xf32>
    %cst_19 = arith.constant dense<0.000000e+00> : vector<8xf32>
    %45 = vector.multi_reduction <add>, %44, %cst_19 [1] : vector<8x128xf32> to vector<8xf32>
    %46 = vector.shape_cast %45 : vector<8xf32> to vector<8x1xf32>
    %47 = math.log %46 : vector<8x1xf32>
    %48 = arith.addf %41, %47 : vector<8x1xf32>
    %c0_20 = arith.constant 0 : index
    %c0_21 = arith.constant 0 : index
    %49 = vector.load %arg2[%c0_20, %c0_21] : memref<8x1xi32, #tpu.memory_space<vmem>>, vector<8x1xi32>
    %50 = vector.broadcast %49 : vector<8x1xi32> to vector<8x128xi32>
    %51 = arith.cmpi eq, %35, %50 : vector<8x128xi32>
    %cst_22 = arith.constant 0.000000e+00 : f32
    %52 = vector.broadcast %cst_22 : f32 to vector<8x128xf32>
    %53 = arith.select %51, %33, %52 : vector<8x128xi1>, vector<8x128xf32>
    %cst_23 = arith.constant dense<0.000000e+00> : vector<8xf32>
    %54 = vector.multi_reduction <add>, %53, %cst_23 [1] : vector<8x128xf32> to vector<8xf32>
    %55 = vector.shape_cast %54 : vector<8xf32> to vector<8x1xf32>
    %c0_24 = arith.constant 0 : index
    %c0_25 = arith.constant 0 : index
    %56 = vector.load %arg9[%c0_24, %c0_25] : memref<1x1xf32, #tpu.memory_space<vmem>>, vector<1x1xf32>
    %57 = arith.subf %48, %55 : vector<8x1xf32>
    %58 = vector.shape_cast %57 : vector<8x1xf32> to vector<1x8x1xf32>
    %cst_26 = arith.constant dense<0.000000e+00> : vector<1xf32>
    %59 = vector.multi_reduction <add>, %58, %cst_26 [1, 2] : vector<1x8x1xf32> to vector<1xf32>
    %60 = vector.shape_cast %59 : vector<1xf32> to vector<1x1x1xf32>
    %61 = vector.extract %60[0, 0, 0] : f32 from vector<1x1x1xf32>
    %62 = vector.broadcast %61 : f32 to vector<1x1xf32>
    %63 = arith.addf %56, %62 : vector<1x1xf32>
    %c0_27 = arith.constant 0 : index
    %c0_28 = arith.constant 0 : index
    %64 = vector.load %arg9[%c0_27, %c0_28] : memref<1x1xf32, #tpu.memory_space<vmem>>, vector<1x1xf32>
    tpu.vector_store %arg9[%c0_27, %c0_28], %63 {strides = array<i32>} : memref<1x1xf32, #tpu.memory_space<vmem>>, vector<1x1xf32>,
    %c0_29 = arith.constant 0 : index
    %c0_30 = arith.constant 0 : index
    %65 = vector.load %arg9[%c0_29, %c0_30] : memref<1x1xf32, #tpu.memory_space<vmem>>, vector<1x1xf32>
    %cst_31 = arith.constant 6.250000e-02 : f32
    %66 = vector.broadcast %cst_31 : f32 to vector<1x1xf32>
    %67 = arith.mulf %65, %66 : vector<1x1xf32>
    %c0_32 = arith.constant 0 : index
    %c0_33 = arith.constant 0 : index
    %68 = vector.load %arg8[%c0_32, %c0_33] : memref<1x1xf32, #tpu.memory_space<vmem>>, vector<1x1xf32>
    tpu.vector_store %arg8[%c0_32, %c0_33], %67 {strides = array<i32>} : memref<1x1xf32, #tpu.memory_space<vmem>>, vector<1x1xf32>,
    return
  }
  func.func @transform_0(%arg0: i32) -> (i32, i32) {
    %c0_i32 = arith.constant 0 : i32
    %c0_i32_0 = arith.constant 0 : i32
    return %arg0, %c0_i32 : i32, i32
  }
  func.func @transform_1(%arg0: i32) -> (i32, i32) {
    %c0_i32 = arith.constant 0 : i32
    %c0_i32_0 = arith.constant 0 : i32
    return %arg0, %c0_i32 : i32, i32
  }
  func.func @transform_2(%arg0: i32) -> (i32, i32) {
    %c0_i32 = arith.constant 0 : i32
    %c0_i32_0 = arith.constant 0 : i32
    %c0_i32_1 = arith.constant 0 : i32
    return %c0_i32, %c0_i32_0 : i32, i32
  }
  func.func @transform_3(%arg0: i32) -> (i32, i32) {
    %c0_i32 = arith.constant 0 : i32
    %c0_i32_0 = arith.constant 0 : i32
    %c0_i32_1 = arith.constant 0 : i32
    return %c0_i32, %c0_i32_0 : i32, i32
  }
  func.func @transform_4(%arg0: i32) -> (i32, i32) {
    %c0_i32 = arith.constant 0 : i32
    %c0_i32_0 = arith.constant 0 : i32
    %c0_i32_1 = arith.constant 0 : i32
    return %c0_i32, %c0_i32_0 : i32, i32
  }
  func.func @transform_5(%arg0: i32) -> (i32, i32) {
    %c0_i32 = arith.constant 0 : i32
    %c0_i32_0 = arith.constant 0 : i32
    %c0_i32_1 = arith.constant 0 : i32
    return %c0_i32, %c0_i32_0 : i32, i32
  }
  func.func @transform_6(%arg0: i32) -> (i32, i32) {
    %c0_i32 = arith.constant 0 : i32
    %c0_i32_0 = arith.constant 0 : i32
    return %arg0, %c0_i32 : i32, i32
  }
  func.func @transform_7(%arg0: i32) -> (i32, i32) {
    %c0_i32 = arith.constant 0 : i32
    %c0_i32_0 = arith.constant 0 : i32
    %c0_i32_1 = arith.constant 0 : i32
    return %c0_i32, %c0_i32_0 : i32, i32
  }
}

</mosaic_0001>

<bundles_post_ra>
// kernel: _lambda_.5
= control target key start
LH: loop header
LB: loop body
LE: loop exit
PB: predicated region body
PF: predicated region fallthrough
CT: control target
= control target key end

     0   :  { %13 = vsyncpa [#allocation4], 0  ;;  %s672_s24 = smov 0   ;;  %s753_s0 = inlined_call_operand.vmem [shape: f32[16,32], index: 0, kind: input, shape index: {}]   ;;  %s754_s1 = inlined_call_operand.vmem [shape: s32[16,1], index: 1, kind: input, shape index: {}]   ;;  %s755_s2 = inlined_call_operand.vmem [shape: f32[1,32], index: 2, kind: input, shape index: {}]   ;;  %s756_s3 = inlined_call_operand.vmem [shape: f32[1,32], index: 3, kind: input, shape index: {}]   ;;  %s757_s4 = inlined_call_operand.vmem [shape: bf16[32,128], index: 4, kind: input, shape index: {}]   ;;  %s758_s5 = inlined_call_operand.vmem [shape: f32[1,128], index: 5, kind: input, shape index: {}]   ;;  %s759_s6 = inlined_call_operand.vmem [shape: f32[16,128], index: 6, kind: output, shape index: {0}]   ;;  %s760_s7 = inlined_call_operand.hbm [shape: f32[1,1], index: 7, kind: output, shape index: {1}]  }
   0x1 LB: > { %s678_s25 = sadd.s32 4294967295, %s625_s24   ;;  %p532_p0 = scmp.ge.s32.totalorder %s625_s24, 1  ;;  %s625_s24 = sphi %s672_s24, %s19_s24  }
   0x2   : > { %p244_p1 = scmp.lt.s32.totalorder %s625_s24, 3 }
   0x4   : > { %p245_p2 = pnand %p532_p0, %p244_p1 }
   0x5   : > { %p278_p3 = scmp.lt.s32.totalorder (!%p245_p2), %s678_s25, 1  ;;  %p536_p4 = scmp.ne.s32.totalorder (!%p245_p2), %s678_s25, 0 }
   0x6   : > { %248 = sbr.rel (%p245_p2) target bundleno = 1101 (0x44d), region = 44 }
   0xd   : > { %s279_s26 = scalar_select %p278_p3, %s678_s25, 1 }
   0xe   : > { %294 = sbr.rel (%p536_p4) target bundleno = 21 (0x15), region = 48  ;;  %vm295_vm0 = vcmask (!%p536_p4), 0   ;;  %v627_v0 = vmov (!%p536_p4), 0.0  }
   0xf   : > { %s684_s27 = sshll.u32 %s279_s26, 3  ;;  %296 = vst.msk [vmem:[#allocation2] sm:$0x1] (!%p536_p4), %vm295_vm0, %v627_v0 }
  0x10   : > { %s281_s30 = scalar_lea.vmem %s753_s0, %s684_s27  ;;  %s285_s10 = scalar_lea.vmem %s754_s1, %s684_s27 }
  0x11   : > { %s289_s13 = scalar_lea.vmem %s759_s6, %s684_s27 }
  0x15 PF: > { %v297_v1 = vld [vmem:[%s281_s30] sm:$0xff]  ;;  %vm300_vm1 = vcmask 261120   ;;  %v628_v9 = vmov 0.0   ;;  %vm629_vm2 = vmmov 0   ;;  %v582_v10 = vld [vmem:[%s757_s4 + $0x8] sm:$0xff]   ;;  %v630_v21 = vmov 0  }
  0x16   : > { %v301_v2 = vsel %vm300_vm1, %v297_v1, 0.0  ;;  %v581_v8 = vld [vmem:[%s757_s4] sm:$0xff]   ;;  %550 = vmatprep.subr.bf16.mxu0 %v628_v9  ;;  %554 = vmatprep.mubr.msk.bf16.mxu0 %vm629_vm2, %v628_v9  ;;  %v397_v22 = vlaneseq  ;;  %vm421_vm5 = vcmask 7168   ;;  %vm434_vm6 = vcmask 0   ;;  %s631_s8 = smov [#allocation3]   ;;  %p564_p5 = scmp.eq.s32.totalorder %s678_s25, 1 }
  0x17   : > { %302 = vadd.xlane.f32.xlu0 %v301_v2  ;;  %551 = vmatpush3.bf16.msra.mxu0 %v581_v8  ;;  %v537_v15 = vld [vmem:[%s755_s2] ss:$0 sm:$0xff]  ;;  %s453_s9 = sshll.u32 %s631_s8, 4  ;;  %s454_s9 = int_to_ptr.vmem [resolvable:$true] %s453_s9 }
  0x18   : > { %552 = vmatprep.subr.bf16.mxu0 %v628_v9  ;;  %v538_v17 = vld [vmem:[%s756_s3] ss:$0 sm:$0xff]  ;;  %579 = vset.pattern.permute.xlu1 %v630_v21  ;;  %v398_v23 = vand.u32 127, %v397_v22  ;;  %s595_s11 = scalar_lea.vmem %s454_s9, 32  ;;  %p596_p9 = scmp.lt.s32.totalorder %s454_s9, %s454_s9 }
  0x19   : > { %580 = vset.pattern.permute.xlu0 %v630_v21  ;;  %v539_v24 = vld [vmem:[%s758_s5] ss:$0 sm:$0xff] }
  0x1a   : > { %vm399_vm3 = vcmp.lt.s32.totalorder %v398_v23, 65  ;;  %v411_v31 = vld [vmem:[%s285_s10] sm:$0xff]  ;;  %s589_s10 = scalar_lea.vmem %s454_s9, 16 }
  0x1b   : > { %553 = vmatpush3.bf16.msra.mxu0 %v582_v10  ;;  %v419_v52 = vld [vmem:[#allocation2] sm:$0x1]  ;;  %p590_p6 = scmp.ne.s32.totalorder %s454_s9, %s589_s10  ;;  %p597_p10 = scmp.lt.s32.totalorder %s595_s11, %s589_s10 }
  0x1d   : > { %p591_p7 = pnand %p590_p6, %p564_p5  ;;  %p598_p11 = por %p597_p10, %p596_p9 }
  0x1f   : > { %p592_p8 = pneg %p591_p7 }
  0x21   : > { %p599_p12 = pnand %p598_p11, %p592_p8 }
  0xa4   : > { %v303_v3 = vpop.xlane.xlu0 %302 }
  0xa5   : > { %v305_v4 = vmul.f32 0.03125, %v303_v3 }
  0xa7   : > { %v306_v5 = vsub.f32 %v297_v1, %v305_v4 }
  0xa9   : > { %v307_v6 = vmul.f32 %v306_v5, %v306_v5 }
  0xab   : > { %v308_v7 = vsel %vm300_vm1, %v307_v6, 0.0 }
  0xac   : > { %309 = vadd.xlane.f32.xlu0 %v308_v7 }
 0x139   : > { %v310_v11 = vpop.xlane.xlu0 %309 }
 0x13a   : > { %v311_v12 = vmul.f32 0.03125, %v310_v11 }
 0x13c   : > { %v312_v13 = vadd.f32 1e-05, %v311_v12 }
 0x13e   : > { %583 = vrsqrt.f32 %v312_v13 }
 0x148   : > { %v584_v14 = vpop.eup %583 }
 0x149   : > { %v314_v16 = vmul.f32 %v584_v14, %v306_v5 }
 0x14b   : > { %v321_v18 = vmul.f32 %v537_v15, %v314_v16 }
 0x14d   : > { %v328_v19 = vadd.f32 %v538_v17, %v321_v18 }
 0x14f   : > { %v329_v20 = vpack.c.bf16 %v328_v19, %v328_v19 }
 0x151   : > { %555 = vmatmul.mubr.msk.bf16.vlgmr.msra.gmra.mrb[0].mxu0 %vm300_vm1, %v329_v20 }
 0x224   : > { %v390_v25 = vpop.f32.mrb[0].mxu0 }
 0x225   : > { %v391_v26 = vadd.f32 %v539_v24, %v390_v25  ;;  %v556_v27 = vpop.f32.mrb[1].mxu0 }
 0x226   : > { %v393_v28 = vpop.f32.mrb[2].mxu0 }
 0x227   : > { %396 = vst [vmem:[%s289_s13] sm:$0xff] %v391_v26  ;;  %v557_v29 = vpop.f32.mrb[3].mxu0  ;;  %v400_v30 = vsel %vm399_vm3, %v391_v26, -1e+30 }
 0x228   : > { %401 = vmax.xlane.f32.xlu1 %v400_v30 }
 0x239   : > { %413 = vperm.xlu1 %579, %v411_v31  }
 0x2b5   : > { %v402_v32 = vpop.xlane.xlu1 %401 }
 0x2b6   : > { %v403_v33 = vsub.f32 %v400_v30, %v402_v32 }
 0x2b8   : > { %v404_v34 = vmul.f32 1.442695, %v403_v33 }
 0x2b9   : > { %v414_v35 = vpop.permute.xlu1 %413 }
 0x2ba   : > { %585 = vpow2.f32 %v404_v34  ;;  %vm415_vm4 = vcmp.eq.s32.totalorder %v398_v23, %v414_v35 }
 0x2bb   : > { %v416_v37 = vsel %vm415_vm4, %v391_v26, 0.0 }
 0x2c4   : > { %v586_v36 = vpop.eup %585 }
 0x2c5   : > { %406 = vadd.xlane.f32.xlu0 %v586_v36 }
 0x2c9   : > { %417 = vadd.xlane.f32.xlu0 %v416_v37 }
 0x352   : > { %v407_v38 = vpop.xlane.xlu0 %406 }
 0x353   : > { %587 = vlog2.f32 %v407_v38 }
 0x356   : > { %v418_v42 = vpop.xlane.xlu0 %417 }
 0x35d   : > { %v588_v39 = vpop.eup %587 }
 0x35e   : > { %v409_v40 = vmul.f32 0.6931472, %v588_v39 }
 0x360   : > { %v410_v41 = vadd.f32 %v409_v40, %v402_v32 }
 0x362   : > { %v420_v43 = vsub.f32 %v410_v41, %v418_v42 }
 0x364   : > { %v422_v44 = vsel %vm421_vm5, %v420_v43, 0.0 }
 0x365   : > { %423 = vadd.xlane.f32.xlu0 %v422_v44 }
 0x3f2   : > { %v424_v45 = vpop.xlane.xlu0 %423 }
 0x3f3   : > { %v425_v46 = vrot.slane %v424_v45, 4 }
 0x3f5   : > { %v426_v47 = vadd.f32 %v425_v46, %v424_v45 }
 0x3f7   : > { %v427_v48 = vrot.slane %v426_v47, 2 }
 0x3f9   : > { %v428_v49 = vadd.f32 %v427_v48, %v426_v47 }
 0x3fb   : > { %v429_v50 = vrot.slane %v428_v49, 1 }
 0x3fd   : > { %v430_v51 = vadd.f32 %v429_v50, %v428_v49 }
 0x3ff   : > { %558 = vpush %v430_v51 }
 0x430   : > { %s559_s27 = spop %558 }
 0x431   : > { %v432_v53 = vstv %s559_s27 }
 0x432   : > { %v433_v54 = vadd.f32 %v432_v53, %v419_v52 }
 0x434   : > { %435 = vst.msk [vmem:[#allocation2] sm:$0x1] %vm434_vm6, %v433_v54 }
 0x43b   : > { %v436_v55 = vld [vmem:[#allocation2] sm:$0x1] }
 0x43c   : > { %v437_v56 = vmul.f32 0.0625, %v436_v55 }
 0x43e   : > { %438 = vst.msk [vmem:[#allocation3] sm:$0x1] %vm434_vm6, %v437_v56 }
 0x43f   : > { %602 = shalt.err (!%p599_p12)
}
 0x440   : > { %s603_s14 = scalar_lea.hbm %s760_s7, 16 }
 0x441   : > { %p604_p13 = scmp.ne.s32.totalorder %s760_s7, %s603_s14  ;;  %p609_p2 = scmp.lt.u32.totalorder %s603_s14, %s760_s7 }
 0x443   : > { %p605_p0 = pnand %p604_p13, %p564_p5 }
 0x445   : > { %p606_p1 = pneg %p605_p0 }
 0x447   : > { %p611_p3 = pnand %p609_p2, %p606_p1 }
 0x449   : > { %614 = shalt.err (!%p611_p3)
}
 0x44a   : > { %561 = dma.vmem_to_hbm [thread:$0]  (%p564_p5), %s454_s9, 16, %s760_s7, [#allocation4]  }
 0x44b   : > { %620 = dma.done.wait (%p564_p5), [#allocation4], 16  }
 0x44c   : > { %622 = vsyncadd (%p564_p5), [#allocation4], 4294967280 }
 0x44d PF: > { %s19_s24 = sadd.s32 1, %s625_s24  }
 0x44e   : > { %p16_p4 = scmp.ge.s32.totalorder %s19_s24, 4  }
 0x450   :  { %18 = sbr.rel (!%p16_p4) target bundleno = 1 (0x1), region = 90 }
 0x457   :  { %473 = vsyncpa [#allocation4], 1 }
 0x458   :  { %475 = vsyncpa [#allocation4 + $0x1], 1 }

// kernel: _lambda_.3
= control target key start
LH: loop header
LB: loop body
LE: loop exit
PB: predicated region body
PF: predicated region fallthrough
CT: control target
= control target key end

     0   :  { %s1837_s21 = smov 0   ;;  %s2021_s0 = inlined_call_operand.vmem [shape: f32[2,8,32], index: 0, kind: input, shape index: {}]   ;;  %s2022_s1 = inlined_call_operand.vmem [shape: f32[1,32], index: 1, kind: input, shape index: {}]   ;;  %s2023_s2 = inlined_call_operand.vmem [shape: f32[1,32], index: 2, kind: input, shape index: {}]   ;;  %s2024_s3 = inlined_call_operand.vmem [shape: bf16[32,96], index: 3, kind: input, shape index: {}]   ;;  %s2025_s4 = inlined_call_operand.vmem [shape: bf16[32,32], index: 4, kind: input, shape index: {}]   ;;  %s2026_s5 = inlined_call_operand.vmem [shape: f32[1,32], index: 5, kind: input, shape index: {}]   ;;  %s2027_s6 = inlined_call_operand.vmem [shape: f32[1,32], index: 6, kind: input, shape index: {}]   ;;  %s2028_s7 = inlined_call_operand.vmem [shape: f32[1,32], index: 7, kind: input, shape index: {}]   ;;  %s2029_s8 = inlined_call_operand.vmem [shape: bf16[32,128], index: 8, kind: input, shape index: {}]   ;;  %s2030_s9 = inlined_call_operand.vmem [shape: f32[1,128], index: 9, kind: input, shape index: {}]   ;;  %s2031_s10 = inlined_call_operand.vmem [shape: bf16[128,32], index: 10, kind: input, shape index: {}]   ;;  %s2032_s11 = inlined_call_operand.vmem [shape: f32[1,32], index: 11, kind: input, shape index: {}]   ;;  %s2033_s12 = inlined_call_operand.vmem [shape: f32[2,8,32], index: 12, kind: output, shape index: {}]  }
   0x1 LB: > { %s1525_s22 = sadd.s32 4294967295, %s1753_s21   ;;  %p1529_p0 = scmp.ge.s32.totalorder %s1753_s21, 1  ;;  %s1753_s21 = sphi %s1837_s21, %s22_s21  }
   0x2   : > { %p361_p1 = scmp.lt.s32.totalorder %s1753_s21, 3 }
   0x4   : > { %p362_p2 = pnand %p1529_p0, %p361_p1 }
   0x5   : > { %p401_p3 = scmp.lt.s32.totalorder (!%p362_p2), %s1525_s22, 1  ;;  %vm413_vm0 = vcmask (!%p362_p2), 261120   ;;  %v1713_v7 = vld [vmem:[%s2024_s3] sm:$0xff] (!%p362_p2)   ;;  %v1755_v8 = vmov (!%p362_p2), 0.0   ;;  %v1714_v9 = vld [vmem:[%s2024_s3 + $0x8] sm:$0xff] (!%p362_p2)   ;;  %vm1756_vm1 = vmmov (!%p362_p2), 0   ;;  %v502_v26 = vlaneseq (!%p362_p2) }
   0x6   : > { %365 = sbr.rel (%p362_p2) target bundleno = 3030 (0xbd6), region = 68  ;;  %1604 = vmatprep.subr.bf16.mxu0 (!%p362_p2), %v1755_v8  ;;  %1617 = vmatprep.subr.mxu1 (!%p362_p2), %v1755_v8  ;;  %v1532_v14 = vld [vmem:[%s2022_s1] ss:$0 sm:$0xff] (!%p362_p2)  ;;  %s1757_s17 = smov (!%p362_p2), 64   ;;  %vm511_vm2 = vcmask (!%p362_p2), 64512   ;;  %vm1189_vm4 = vcmask (!%p362_p2), 130048  }
   0x7   : > { %1605 = vmatpush3.bf16.msra.mxu0 (!%p362_p2), %v1713_v7  ;;  %1608 = vmatprep.mubr.msk.bf16.mxu0 (!%p362_p2), %vm1756_vm1, %v1755_v8  ;;  %v1533_v16 = vld [vmem:[%s2023_s2] ss:$0 sm:$0xff] (!%p362_p2)  ;;  %s1758_s18 = smov (!%p362_p2), 96   ;;  %s1759_s19 = smov (!%p362_p2), 88   ;;  %v503_v27 = vshrl.u32 (!%p362_p2), %v502_v26, 7  ;;  %v505_v28 = vand.u32 (!%p362_p2), 127, %v502_v26 }
   0x8   : > { %1606 = vmatprep.subr.bf16.mxu0 (!%p362_p2), %v1755_v8  ;;  %1619 = vmatprep.mubr.msk.f32.mxu1 (!%p362_p2), %vm1756_vm1, %v1755_v8  ;;  %s1760_s20 = smov (!%p362_p2), 120   ;;  %v1761_v30 = vmov (!%p362_p2), -1e+30   ;;  %s1762_s24 = smov (!%p362_p2), 80   ;;  %vm1191_vm5 = vcmask (!%p362_p2), 195584  }
   0x9   : > { %vm506_vm3 = vcmp.ge.s32.totalorder (!%p362_p2), %v503_v27, %v505_v28  ;;  %s1763_s25 = smov (!%p362_p2), 112   ;;  %s1765_s27 = smov (!%p362_p2), 104  }
   0xa   : > { %v507_v31 = vsel (!%p362_p2), %vm506_vm3, 0.0, %v1761_v30  ;;  %s1766_s28 = smov (!%p362_p2), 48   ;;  %s1767_s29 = smov (!%p362_p2), 40  }
   0xb   : > { %1607 = vmatpush3.bf16.msra.mxu0 (!%p362_p2), %v1714_v9  ;;  %s1768_s30 = smov (!%p362_p2), 56  }
   0xc   : > { %1612 = vmatprep.subr.mxu0 (!%p362_p2), %v1755_v8 }
   0xd   : > { %s2035_s22 = smov (!%p401_p3, %s1525_s22), 1 }
   0xe   : > { %s1530_s23 = sshll.u32 %s2035_s22, 3 }
   0xf   : > { %s404_s26 = scalar_lea.vmem %s2021_s0, %s1530_s23 }
  0x10   : > { %v410_v0 = vld [vmem:[%s404_s26] sm:$0xff]  ;;  %s1764_s26 = smov 72  }
  0x11   : > { %v414_v1 = vsel %vm413_vm0, %v410_v0, 0.0 }
  0x12   : > { %415 = vadd.xlane.f32.xlu0 %v414_v1 }
  0x9f   : > { %v416_v2 = vpop.xlane.xlu0 %415 }
  0xa0   : > { %v418_v3 = vmul.f32 0.03125, %v416_v2 }
  0xa2   : > { %v419_v4 = vsub.f32 %v410_v0, %v418_v3 }
  0xa4   : > { %v420_v5 = vmul.f32 %v419_v4, %v419_v4 }
  0xa6   : > { %v421_v6 = vsel %vm413_vm0, %v420_v5, 0.0 }
  0xa7   : > { %422 = vadd.xlane.f32.xlu0 %v421_v6 }
 0x134   : > { %v423_v10 = vpop.xlane.xlu0 %422 }
 0x135   : > { %v424_v11 = vmul.f32 0.03125, %v423_v10 }
 0x137   : > { %v425_v12 = vadd.f32 1e-05, %v424_v11 }
 0x139   : > { %1727 = vrsqrt.f32 %v425_v12 }
 0x143   : > { %v1728_v13 = vpop.eup %1727 }
 0x144   : > { %v427_v15 = vmul.f32 %v1728_v13, %v419_v4 }
 0x146   : > { %v434_v17 = vmul.f32 %v1532_v14, %v427_v15 }
 0x148   : > { %v1875_v18 = vadd.f32 %v1533_v16, %v434_v17 }
 0x14a   : > { %v442_v19 = vpack.c.bf16 %v1875_v18, %v1875_v18 }
 0x14c   : > { %1609 = vmatmul.mubr.msk.bf16.vlgmr.msra.gmra.mrb[0].mxu0 %vm413_vm0, %v442_v19 }
 0x14d   : > { %1614 = vmatprep.mubr.msk.f32.mxu0 %vm1756_vm1, %v1755_v8 }
 0x21f   : > { %v1882_v20 = vpop.f32.mrb[0].mxu0 }
 0x220   : > { %599 = vrot.lane.b32.xlu0 %v1882_v20, %s1757_s17  ;;  %509 = vrot.lane.b32.xlu1 %v1882_v20, %s1758_s18  ;;  %v1610_v21 = vpop.f32.mrb[1].mxu0  ;;  %s1769_s17 = smov 8   ;;  %s1770_s18 = smov 16  }
 0x221   : > { %v499_v22 = vpop.f32.mrb[2].mxu0 }
 0x222   : > { %v1611_v23 = vpop.f32.mrb[3].mxu0 }
 0x224   : > { %677 = vrot.lane.b32.xlu0 %v1882_v20, %s1759_s19  ;;  %s1771_s19 = smov 24  }
 0x228   : > { %675 = vrot.lane.b32.xlu0 %v1882_v20, %s1760_s20 }
 0x292   : > { %v600_v24 = vpop.permute.xlu0 %599  ;;  %v510_v25 = vpop.permute.xlu1 %509 }
 0x293   : > { %1613 = vmatpush3.xpose.msk.msra.mxu0 %vm511_vm2, %v510_v25  ;;  %1618 = vmatpush3.msra.mxu1 %v600_v24 }
 0x294   : > { %1622 = vmatprep.subr.mxu1 %v1755_v8  ;;  %1627 = vmatprep.subr.mxu0 %v1755_v8 }
 0x296   : > { %1615 = vmatmul.mubr.msk.f32.vlgmr.msra.gmra.mrb[4].mxu0 %vm511_vm2, %v1882_v20  ;;  %v678_v41 = vpop.permute.xlu0 %677 }
 0x297   : > { %1629 = vmatprep.mubr.msk.f32.mxu0 %vm1756_vm1, %v1755_v8 }
 0x29a   : > { %v676_v42 = vpop.permute.xlu0 %675 }
 0x369   : > { %v582_v29 = vpop.f32.mrb[4].mxu0 }
 0x36a   : > { %v586_v32 = vmul.f32 0.17677669, %v582_v29  ;;  %v1616_v33 = vpop.f32.mrb[5].mxu0 }
 0x36b   : > { %v1716_v33 = vld [vmem:[%s2025_s4 + $0x8] sm:$0xff]  }
 0x36c   : > { %v587_v34 = vadd.f32 %v586_v32, %v507_v31  ;;  %v1715_v32 = vld [vmem:[%s2025_s4] sm:$0xff]  }
 0x36e   : > { %v588_v35 = vsel %vm511_vm2, %v587_v34, -inf }
 0x36f   : > { %589 = vmax.xlane.f32.xlu1 %v588_v35 }
 0x380   : > { %844 = vrot.lane.b32.xlu1 %v1882_v20, %s1762_s24 }
 0x3fc   : > { %v590_v36 = vpop.xlane.xlu1 %589 }
 0x3fd   : > { %v591_v37 = vsub.f32 %v587_v34, %v590_v36 }
 0x3ff   : > { %v592_v38 = vmul.f32 1.442695, %v591_v37 }
 0x400   : > { %v845_v47 = vpop.permute.xlu1 %844 }
 0x401   : > { %1729 = vpow2.f32 %v592_v38 }
 0x40b   : > { %v1730_v39 = vpop.eup %1729 }
 0x40c   : > { %v594_v40 = vsel %vm511_vm2, %v1730_v39, 0.0 }
 0x40d   : > { %595 = vadd.xlane.f32.xlu0 %v594_v40 }
 0x423   : > { %842 = vrot.lane.b32.xlu0 %v1882_v20, %s1763_s25  ;;  %s408_s25 = scalar_lea.vmem %s2033_s12, %s1530_s23 }
 0x427   : > { %1011 = vrot.lane.b32.xlu0 %v1882_v20, %s1764_s26 }
 0x42b   : > { %1009 = vrot.lane.b32.xlu0 %v1882_v20, %s1765_s27 }
 0x49a   : > { %v596_v43 = vpop.xlane.xlu0 %595 }
 0x49b   : > { %1731 = vrcp.f32 %v596_v43 }
 0x49e   : > { %v843_v46 = vpop.permute.xlu0 %842 }
 0x4a2   : > { %v1012_v48 = vpop.permute.xlu0 %1011 }
 0x4a5   : > { %v1732_v44 = vpop.eup %1731 }
 0x4a6   : > { %v598_v45 = vmul.f32 %v1732_v44, %v1730_v39  ;;  %v1010_v49 = vpop.permute.xlu0 %1009 }
 0x4a8   : > { %1620 = vmatmul.mubr.msk.f32.vlgmr.msra.gmra.mrb[0].mxu1 %vm511_vm2, %v598_v45 }
 0x4a9   : > { %1623 = vmatpush3.xpose.msk.msra.mxu1 %vm511_vm2, %v678_v41  ;;  %1624 = vmatprep.mubr.msk.f32.mxu1 %vm1756_vm1, %v1755_v8 }
 0x4aa   : > { %1632 = vmatprep.subr.mxu1 %v1755_v8 }
 0x4ac   : > { %1625 = vmatmul.mubr.msk.f32.vlgmr.msra.gmra.mrb[2].mxu1 %vm511_vm2, %v676_v42 }
 0x4ad   : > { %1633 = vmatpush3.xpose.msk.msra.mxu1 %vm511_vm2, %v845_v47  ;;  %1634 = vmatprep.mubr.msk.f32.mxu1 %vm1756_vm1, %v1755_v8  ;;  %v1549_v47 = vld [vmem:[%s2026_s5] ss:$0 sm:$0xff] }
 0x4ae   : > { %1642 = vmatprep.subr.mxu1 %v1755_v8 }
 0x4b0   : > { %1635 = vmatmul.mubr.msk.f32.vlgmr.msra.gmra.mrb[4].mxu1 %vm511_vm2, %v843_v46 }
 0x4b1   : > { %1643 = vmatpush3.xpose.msk.msra.mxu1 %vm511_vm2, %v1012_v48  ;;  %1644 = vmatprep.mubr.msk.f32.mxu1 %vm1756_vm1, %v1755_v8 }
 0x4b2   : > { %1668 = vmatprep.subr.bf16.mxu1 %v1755_v8 }
 0x4b4   : > { %1645 = vmatmul.mubr.msk.f32.vlgmr.msra.gmra.mrb[6].mxu1 %vm511_vm2, %v1010_v49 }
 0x4b5   : > { %1684 = vmatprep.mubr.msk.bf16.mxu1 %vm1756_vm1, %v1755_v8 }
 0x57b   : > { %v1919_v50 = vpop.f32.mrb[0].mxu1 }
 0x57c   : > { %v1621_v51 = vpop.f32.mrb[1].mxu1 }
 0x57f   : > { %v749_v52 = vpop.f32.mrb[2].mxu1 }
 0x580   : > { %v753_v53 = vmul.f32 0.17677669, %v749_v52  ;;  %v1626_v54 = vpop.f32.mrb[3].mxu1 }
 0x582   : > { %v754_v55 = vadd.f32 %v753_v53, %v507_v31 }
 0x583   : > { %v916_v56 = vpop.f32.mrb[4].mxu1 }
 0x584   : > { %v920_v57 = vmul.f32 0.17677669, %v916_v56  ;;  %v1636_v58 = vpop.f32.mrb[5].mxu1  ;;  %v755_v59 = vsel %vm511_vm2, %v754_v55, -inf }
 0x585   : > { %756 = vmax.xlane.f32.xlu0 %v755_v59 }
 0x586   : > { %v921_v60 = vadd.f32 %v920_v57, %v507_v31 }
 0x587   : > { %v1083_v61 = vpop.f32.mrb[6].mxu1 }
 0x588   : > { %v1087_v62 = vmul.f32 0.17677669, %v1083_v61  ;;  %v1646_v63 = vpop.f32.mrb[7].mxu1  ;;  %v922_v0 = vsel %vm511_vm2, %v921_v60, -inf  ;;  %v1718_v61 = vld [vmem:[%s2029_s8 + $0x8] sm:$0xff]  }
 0x589   : > { %923 = vmax.xlane.f32.xlu1 %v922_v0  ;;  %v1721_v63 = vld [vmem:[%s2031_s10 + $0x10] sm:$0xff]   ;;  %v1722_v0 = vld [vmem:[%s2031_s10 + $0x18] sm:$0xff]  }
 0x58a   : > { %v1088_v1 = vadd.f32 %v1087_v62, %v507_v31  ;;  %v1720_v62 = vld [vmem:[%s2031_s10 + $0x8] sm:$0xff]  }
 0x58c   : > { %v1089_v2 = vsel %vm511_vm2, %v1088_v1, -inf }
 0x58d   : > { %1090 = vmax.xlane.f32.xlu0 %v1089_v2  ;;  %v1724_v2 = vld [vmem:[%s2031_s10 + $0x28] sm:$0xff]  }
 0x59a   : > { %933 = vrot.lane.b32.xlu1 %v1882_v20, %s1766_s28 }
 0x612   : > { %v757_v3 = vpop.xlane.xlu0 %756 }
 0x613   : > { %v758_v4 = vsub.f32 %v754_v55, %v757_v3 }
 0x615   : > { %v759_v5 = vmul.f32 1.442695, %v758_v4 }
 0x616   : > { %v924_v6 = vpop.xlane.xlu1 %923 }
 0x617   : > { %1733 = vpow2.f32 %v759_v5  ;;  %v925_v7 = vsub.f32 %v921_v60, %v924_v6  ;;  %v1717_v60 = vld [vmem:[%s2029_s8] sm:$0xff]  }
 0x619   : > { %v926_v9 = vmul.f32 1.442695, %v925_v7  ;;  %v1553_v7 = vld [vmem:[%s2027_s6] ss:$0 sm:$0xff] }
 0x61a   : > { %v1091_v10 = vpop.xlane.xlu0 %1090  ;;  %v934_v22 = vpop.permute.xlu1 %933 }
 0x61b   : > { %1735 = vpow2.f32 %v926_v9  ;;  %v1092_v11 = vsub.f32 %v1088_v1, %v1091_v10  ;;  %v1723_v1 = vld [vmem:[%s2031_s10 + $0x20] sm:$0xff]  }
 0x61c   : > { %v1554_v10 = vld [vmem:[%s2028_s7] ss:$0 sm:$0xff] }
 0x61d   : > { %v1093_v12 = vmul.f32 1.442695, %v1092_v11 }
 0x61f   : > { %1737 = vpow2.f32 %v1093_v12 }
 0x621   : > { %v1734_v13 = vpop.eup %1733 }
 0x622   : > { %v761_v14 = vsel %vm511_vm2, %v1734_v13, 0.0 }
 0x623   : > { %762 = vadd.xlane.f32.xlu0 %v761_v14  ;;  %v1725_v14 = vld [vmem:[%s2031_s10 + $0x30] sm:$0xff]  }
 0x625   : > { %v1736_v15 = vpop.eup %1735 }
 0x626   : > { %v928_v16 = vsel %vm511_vm2, %v1736_v15, 0.0 }
 0x627   : > { %929 = vadd.xlane.f32.xlu0 %v928_v16  ;;  %v1555_v16 = vld [vmem:[%s2030_s9] ss:$0 sm:$0xff] }
 0x629   : > { %v1738_v17 = vpop.eup %1737 }
 0x62a   : > { %v1095_v19 = vsel %vm511_vm2, %v1738_v17, 0.0 }
 0x62b   : > { %1096 = vadd.xlane.f32.xlu1 %v1095_v19 }
 0x63c   : > { %1100 = vrot.lane.b32.xlu1 %v1882_v20, %s1767_s29 }
 0x63d   : > { %766 = vrot.lane.b32.xlu0 %v1882_v20, %s1768_s30 }
 0x6b0   : > { %v763_v21 = vpop.xlane.xlu0 %762 }
 0x6b1   : > { %1739 = vrcp.f32 %v763_v21 }
 0x6b4   : > { %v930_v23 = vpop.xlane.xlu0 %929 }
 0x6b5   : > { %1741 = vrcp.f32 %v930_v23 }
 0x6b8   : > { %v1097_v24 = vpop.xlane.xlu1 %1096  ;;  %v767_v25 = vpop.permute.xlu0 %766 }
 0x6b9   : > { %1743 = vrcp.f32 %v1097_v24  ;;  %1628 = vmatpush3.msra.mxu0 %v767_v25 }
 0x6ba   : > { %1637 = vmatprep.subr.mxu0 %v1755_v8 }
 0x6bb   : > { %v1740_v26 = vpop.eup %1739 }
 0x6bc   : > { %v765_v27 = vmul.f32 %v1740_v26, %v1734_v13  ;;  %v1101_v29 = vpop.permute.xlu1 %1100 }
 0x6be   : > { %1630 = vmatmul.mubr.msk.f32.vlgmr.msra.gmra.mrb[6].mxu0 %vm511_vm2, %v765_v27 }
 0x6bf   : > { %v1742_v28 = vpop.eup %1741  ;;  %1638 = vmatpush3.msra.mxu0 %v934_v22  ;;  %1639 = vmatprep.mubr.msk.f32.mxu0 %vm1756_vm1, %v1755_v8 }
 0x6c0   : > { %v932_v20 = vmul.f32 %v1742_v28, %v1736_v15  ;;  %1647 = vmatprep.subr.mxu0 %v1755_v8  ;;  %v1726_v15 = vld [vmem:[%s2031_s10 + $0x38] sm:$0xff]  }
 0x6c2   : > { %1640 = vmatmul.mubr.msk.f32.vlgmr.msra.gmra.mrb[8].mxu0 %vm511_vm2, %v932_v20 }
 0x6c3   : > { %v1744_v30 = vpop.eup %1743  ;;  %1648 = vmatpush3.msra.mxu0 %v1101_v29  ;;  %1649 = vmatprep.mubr.msk.f32.mxu0 %vm1756_vm1, %v1755_v8 }
 0x6c4   : > { %v1099_v31 = vmul.f32 %v1744_v30, %v1738_v17  ;;  %1652 = vmatprep.subr.bf16.mxu0 %v1755_v8 }
 0x6c6   : > { %1650 = vmatmul.mubr.msk.f32.vlgmr.msra.gmra.mrb[10].mxu0 %vm511_vm2, %v1099_v31 }
 0x6c7   : > { %1656 = vmatprep.mubr.msk.bf16.mxu0 %vm1756_vm1, %v1755_v8  ;;  %1653 = vmatpush3.bf16.msra.mxu0 %v1715_v32 }
 0x6c8   : > { %1654 = vmatprep.subr.bf16.mxu0 %v1755_v8 }
 0x6cb   : > { %1655 = vmatpush3.bf16.msra.mxu0 %v1716_v33 }
 0x6cc   : > { %1660 = vmatprep.subr.bf16.mxu0 %v1755_v8 }
 0x791   : > { %v838_v34 = vpop.f32.mrb[6].mxu0 }
 0x792   : > { %1177 = vrot.lane.b32.xlu1 %v838_v34, %s1769_s17  ;;  %v1631_v35 = vpop.f32.mrb[7].mxu0 }
 0x795   : > { %v1005_v36 = vpop.f32.mrb[8].mxu0 }
 0x796   : > { %1181 = vrot.lane.b32.xlu0 %v1005_v36, %s1770_s18  ;;  %v1641_v37 = vpop.f32.mrb[9].mxu0 }
 0x799   : > { %v1172_v38 = vpop.f32.mrb[10].mxu0 }
 0x79a   : > { %1185 = vrot.lane.b32.xlu1 %v1172_v38, %s1771_s19  ;;  %v1651_v39 = vpop.f32.mrb[11].mxu0 }
 0x804   : > { %v1178_v40 = vpop.permute.xlu1 %1177 }
 0x805   : > { %v1188_v42 = vsel %vm511_vm2, %v1919_v50, %v1178_v40 }
 0x808   : > { %v1182_v41 = vpop.permute.xlu0 %1181 }
 0x809   : > { %v1190_v43 = vsel %vm1189_vm4, %v1188_v42, %v1182_v41 }
 0x80c   : > { %v1186_v44 = vpop.permute.xlu1 %1185 }
 0x80d   : > { %v1192_v45 = vsel %vm1191_vm5, %v1190_v43, %v1186_v44 }
 0x80e   : > { %v1193_v46 = vpack.c.bf16 %v1192_v45, %v1192_v45 }
 0x810   : > { %1657 = vmatmul.mubr.msk.bf16.vlgmr.msra.gmra.mrb[12].mxu0 %vm413_vm0, %v1193_v46 }
 0x811   : > { %1664 = vmatprep.mubr.msk.bf16.mxu0 %vm1756_vm1, %v1755_v8  ;;  %1661 = vmatpush3.bf16.msra.mxu0 %v1717_v60 }
 0x812   : > { %1662 = vmatprep.subr.bf16.mxu0 %v1755_v8 }
 0x815   : > { %1663 = vmatpush3.bf16.msra.mxu0 %v1718_v61 }
 0x8e3   : > { %v1254_v48 = vpop.f32.mrb[12].mxu0 }
 0x8e4   : > { %v1255_v49 = vadd.f32 %v1549_v47, %v1254_v48  ;;  %v1658_v51 = vpop.f32.mrb[13].mxu0 }
 0x8e5   : > { %v1257_v52 = vpop.f32.mrb[14].mxu0 }
 0x8e6   : > { %v1659_v53 = vpop.f32.mrb[15].mxu0  ;;  %v1260_v50 = vadd.f32 %v1255_v49, %v1875_v18  ;;  %v1719_v18 = vld [vmem:[%s2031_s10] sm:$0xff]  }
 0x8e7   : > { %1669 = vmatpush3.bf16.msra.mxu1 %v1719_v18 }
 0x8e8   : > { %v1263_v54 = vsel %vm413_vm0, %v1260_v50, 0.0  ;;  %1670 = vmatprep.subr.bf16.mxu1 %v1755_v8 }
 0x8e9   : > { %1264 = vadd.xlane.f32.xlu0 %v1263_v54 }
 0x8eb   : > { %1671 = vmatpush3.bf16.msra.mxu1 %v1720_v62 }
 0x8ec   : > { %1672 = vmatprep.subr.bf16.mxu1 %v1755_v8 }
 0x8ef   : > { %1673 = vmatpush3.bf16.msra.mxu1 %v1721_v63 }
 0x8f0   : > { %1674 = vmatprep.subr.bf16.mxu1 %v1755_v8 }
 0x8f3   : > { %1675 = vmatpush3.bf16.msra.mxu1 %v1722_v0 }
 0x8f4   : > { %1676 = vmatprep.subr.bf16.mxu1 %v1755_v8 }
 0x8f7   : > { %1677 = vmatpush3.bf16.msra.mxu1 %v1723_v1 }
 0x8f8   : > { %1678 = vmatprep.subr.bf16.mxu1 %v1755_v8 }
 0x8fb   : > { %1679 = vmatpush3.bf16.msra.mxu1 %v1724_v2 }
 0x8fc   : > { %1680 = vmatprep.subr.bf16.mxu1 %v1755_v8 }
 0x8ff   : > { %1681 = vmatpush3.bf16.msra.mxu1 %v1725_v14 }
 0x900   : > { %1682 = vmatprep.subr.bf16.mxu1 %v1755_v8  ;;  %v1559_v8 = vld [vmem:[%s2032_s11] ss:$0 sm:$0xff] }
 0x903   : > { %1683 = vmatpush3.bf16.msra.mxu1 %v1726_v15 }
 0x976   : > { %v1265_v55 = vpop.xlane.xlu0 %1264 }
 0x977   : > { %v1266_v56 = vmul.f32 0.03125, %v1265_v55 }
 0x979   : > { %v1267_v57 = vsub.f32 %v1260_v50, %v1266_v56 }
 0x97b   : > { %v1268_v58 = vmul.f32 %v1267_v57, %v1267_v57 }
 0x97d   : > { %v1269_v59 = vsel %vm413_vm0, %v1268_v58, 0.0 }
 0x97e   : > { %1270 = vadd.xlane.f32.xlu1 %v1269_v59 }
 0xa0b   : > { %v1271_v3 = vpop.xlane.xlu1 %1270 }
 0xa0c   : > { %v1272_v4 = vmul.f32 0.03125, %v1271_v3 }
 0xa0e   : > { %v1273_v5 = vadd.f32 1e-05, %v1272_v4 }
 0xa10   : > { %1745 = vrsqrt.f32 %v1273_v5 }
 0xa1a   : > { %v1746_v6 = vpop.eup %1745 }
 0xa1b   : > { %v1275_v9 = vmul.f32 %v1746_v6, %v1267_v57 }
 0xa1d   : > { %v1282_v11 = vmul.f32 %v1553_v7, %v1275_v9 }
 0xa1f   : > { %v1289_v12 = vadd.f32 %v1554_v10, %v1282_v11 }
 0xa21   : > { %v1290_v13 = vpack.c.bf16 %v1289_v12, %v1289_v12 }
 0xa23   : > { %1665 = vmatmul.mubr.msk.bf16.vlgmr.msra.gmra.mrb[16].mxu0 %vm413_vm0, %v1290_v13 }
 0xaf6   : > { %v1351_v17 = vpop.f32.mrb[16].mxu0 }
 0xaf7   : > { %v1352_v19 = vadd.f32 %v1555_v16, %v1351_v17  ;;  %v1666_v21 = vpop.f32.mrb[17].mxu0 }
 0xaf8   : > { %v1354_v22 = vpop.f32.mrb[18].mxu0 }
 0xaf9   : > { %v1357_v23 = vmax.f32 %v1352_v19, 0.0  ;;  %v1667_v24 = vpop.f32.mrb[19].mxu0 }
 0xafb   : > { %v1358_v25 = vpack.c.bf16 %v1357_v23, %v1357_v23 }
 0xafd   : > { %1685 = vmatmul.mubr.bf16.vlgmr.msra.gmra.mrb[8].mxu1 %v1358_v25 }
 0xbd0   : > { %v1464_v26 = vpop.f32.mrb[8].mxu1 }
 0xbd1   : > { %v1465_v27 = vadd.f32 %v1559_v8, %v1464_v26  ;;  %v1686_v28 = vpop.f32.mrb[9].mxu1 }
 0xbd2   : > { %v1467_v20 = vpop.f32.mrb[10].mxu1 }
 0xbd3   : > { %v1470_v29 = vadd.f32 %v1465_v27, %v1289_v12  ;;  %v1687_v30 = vpop.f32.mrb[11].mxu1 }
 0xbd5   : > { %1471 = vst.msk [vmem:[%s408_s25] sm:$0xff] %vm413_vm0, %v1470_v29 }
 0xbd6 PF: > { %s22_s21 = sadd.s32 1, %s1753_s21  }
 0xbd7   : > { %p19_p4 = scmp.ge.s32.totalorder %s22_s21, 4  }
 0xbd9   :  { %21 = sbr.rel (!%p19_p4) target bundleno = 1 (0x1), region = 98 }

</bundles_post_ra>
